<compile_context>
chip_gen: v7x
topology: tpu7x:2x2x1
jax: 0.10.0
libtpu: 0.0.40
codegen_flags: <defaults>
</compile_context>

<pallas_src>
import functools

import jax
import jax.numpy as jnp
from jax import lax
from jax.experimental import pallas as pl
from jax.experimental.pallas import tpu as pltpu


# ----------------------------------------------------------------------------
# Fused kernel: embeddings + n_conv x (CGConv + BatchNorm [+ ReLU])
# ----------------------------------------------------------------------------
def _cgcnn_fused_kernel(
    x_ref, eattr_ref, src_col_ref, dst_col_ref, dst_row_ref,
    emb1_w_ref, emb1_b_ref, emb2_w_ref, emb2_b_ref,
    wi_ref, wj_ref, we_ref, wb_ref, gamma_ref, beta_ref,
    o_ref,
    *, n_conv, atom_fea_len, bn_eps,
):
    f = atom_fea_len

    # ---- embeddings; h and e stay resident for the whole forward -----------
    h = (jnp.dot(x_ref[...], emb1_w_ref[...], preferred_element_type=jnp.float32)
         + emb1_b_ref[...])                                            # (N, F)
    e = (jnp.dot(eattr_ref[...], emb2_w_ref[...], preferred_element_type=jnp.float32)
         + emb2_b_ref[...])                                            # (E, F)

    n_nodes = h.shape[0]
    n_edges = e.shape[0]

    # ---- one-hot gather / scatter matrices: built ONCE, reused by all layers.
    # 0/1 values are exact in bf16 -> cheaper MXU feed on the (E,N)-scale dots.
    src_col = src_col_ref[...]                                         # (E, 1) int32
    dst_col = dst_col_ref[...]                                         # (E, 1) int32
    dst_row = dst_row_ref[...]                                         # (1, E) int32

    iota_en = lax.broadcasted_iota(jnp.int32, (n_edges, n_nodes), 1)
    iota_ne = lax.broadcasted_iota(jnp.int32, (n_nodes, n_edges), 0)
    g_src = (iota_en == src_col).astype(jnp.bfloat16)  # (E,N): row e selects x[src[e]] (= x_j)
    g_dst = (iota_en == dst_col).astype(jnp.bfloat16)  # (E,N): row e selects x[dst[e]] (= x_i)
    s_dst = (iota_ne == dst_row).astype(jnp.bfloat16)  # (N,E): scatter-add msgs to dst (lane-dense feed)

    for l in range(n_conv):
        wi = wi_ref[l]          # (F, 2F) packed [lin_f | lin_s] block acting on x_i
        wj = wj_ref[l]          # (F, 2F) packed block acting on x_j
        we = we_ref[l]          # (F, 2F) packed block acting on edge_attr
        wb = wb_ref[l]          # (1, 2F) packed bias

        # Apply weights at node granularity, then gather to edges.
        xi_w = jnp.dot(h, wi, preferred_element_type=jnp.float32)       # (N, 2F)
        xj_w = jnp.dot(h, wj, preferred_element_type=jnp.float32)       # (N, 2F)
        e_w = jnp.dot(e, we, preferred_element_type=jnp.float32) + wb   # (E, 2F)

        # bf16 one-hot gathers (exact selection; gathered values rounded to bf16 —
        # deliberate MXU-throughput/precision boundary), f32 accumulation.
        z = (jnp.dot(g_dst, xi_w.astype(jnp.bfloat16), preferred_element_type=jnp.float32)
             + jnp.dot(g_src, xj_w.astype(jnp.bfloat16), preferred_element_type=jnp.float32)
             + e_w)                                                      # (E, 2F)

        # split packed z into the f (gate) and s (message) halves; f32 elementwise.
        msg = jax.nn.sigmoid(z[:, :f]) * jax.nn.softplus(z[:, f:])       # (E, F)

        # Scatter-add back to destination nodes with the (N,E)-oriented one-hot
        # (standard contraction, no implicit LHS transpose), then residual add.
        agg = jnp.dot(s_dst, msg.astype(jnp.bfloat16),
                      preferred_element_type=jnp.float32)                # (N, F)
        h = h + agg

        # Fused BatchNorm1d (training mode: batch stats, biased variance) + ReLU.
        mean = jnp.mean(h, axis=0, keepdims=True)
        var = jnp.mean((h - mean) ** 2, axis=0, keepdims=True)
        h = (h - mean) * lax.rsqrt(var + bn_eps) * gamma_ref[l] + beta_ref[l]
        if l != n_conv - 1:
            h = jnp.maximum(h, 0.0)
        # F.dropout with p=0 is the identity -> omitted.

    # TODO(synk): output last dim is 64 (half-masked stores); could store a 128-lane
    # padded slab and narrow outside the kernel for store-bound regimes.
    o_ref[...] = h


# ----------------------------------------------------------------------------
# Wrapper
# ----------------------------------------------------------------------------
_VMEM = pl.BlockSpec(memory_space=pltpu.MemorySpace.VMEM)


def cgcnn_forward(params, x, edge_index, edge_attr, *, bn_eps=1e-5):
    n_nodes = x.shape[0]
    atom_fea_len = params["emb1_w"].shape[1]
    n_conv = params["wi"].shape[0]

    src = edge_index[0].astype(jnp.int32)   # message source  -> x_j
    dst = edge_index[1].astype(jnp.int32)   # message target  -> x_i / aggregation index

    args = (
        x.astype(jnp.float32), edge_attr.astype(jnp.float32),
        src.reshape(-1, 1), dst.reshape(-1, 1), dst.reshape(1, -1),
        params["emb1_w"], params["emb1_b"],
        params["emb2_w"], params["emb2_b"],
        params["wi"], params["wj"], params["we"], params["wb"],
        params["gamma"], params["beta"],
    )
    kernel = functools.partial(
        _cgcnn_fused_kernel,
        n_conv=n_conv, atom_fea_len=atom_fea_len, bn_eps=bn_eps,
    )
    return pl.pallas_call(
        kernel,
        out_shape=jax.ShapeDtypeStruct((n_nodes, atom_fea_len), jnp.float32),
        in_specs=[_VMEM] * len(args),
        out_specs=_VMEM,
    )(*args)


# ----------------------------------------------------------------------------
# Parameter init (deterministic, mirrors torch nn.Linear default init bounds)
# ----------------------------------------------------------------------------
def _uniform(key, shape, fan_in):
    bound = 1.0 / (fan_in ** 0.5)
    return jax.random.uniform(key, shape, jnp.float32, -bound, bound)


def init_params(key, orig_atom_fea_len, nbr_fea_len, atom_fea_len, n_conv):
    f = atom_fea_len
    keys = jax.random.split(key, 8)
    fan_conv = 3 * f   # CGConv linears act on cat([x_i, x_j, edge_attr])
    return {
        # linear weights stored pre-transposed as [in, out]; biases as (1, out)
        "emb1_w": _uniform(keys[0], (orig_atom_fea_len, f), orig_atom_fea_len),
        "emb1_b": _uniform(keys[1], (1, f), orig_atom_fea_len),
        "emb2_w": _uniform(keys[2], (nbr_fea_len, f), nbr_fea_len),
        "emb2_b": _uniform(keys[3], (1, f), nbr_fea_len),
        # per-layer CGConv weights; lin_f / lin_s packed along the output dim:
        #   wi = [wf_i | ws_i] (applied to x_i), wj -> x_j, we -> edge_attr.
        "wi": _uniform(keys[4], (n_conv, f, 2 * f), fan_conv),
        "wj": _uniform(keys[5], (n_conv, f, 2 * f), fan_conv),
        "we": _uniform(keys[6], (n_conv, f, 2 * f), fan_conv),
        "wb": _uniform(keys[7], (n_conv, 1, 2 * f), fan_conv),
        # BatchNorm1d affine params
        "gamma": jnp.ones((n_conv, 1, f), jnp.float32),
        "beta": jnp.zeros((n_conv, 1, f), jnp.float32),
    }


# ----------------------------------------------------------------------------
# Pure-JAX reference (jnp gather / scatter-add) for validation.  It mirrors the
# kernel's deliberate bf16 rounding at the gather/scatter MXU boundary; all the
# rest is plain f32 math identical to the PyTorch module's forward.
# ----------------------------------------------------------------------------
def cgcnn_reference(params, x, edge_index, edge_attr, *, bn_eps=1e-5):
    h = x @ params["emb1_w"] + params["emb1_b"]
    e = edge_attr @ params["emb2_w"] + params["emb2_b"]
    src, dst = edge_index[0], edge_index[1]
    n_conv = params["wi"].shape[0]
    f = h.shape[1]
    for l in range(n_conv):
        xi_w = (h @ params["wi"][l]).astype(jnp.bfloat16).astype(jnp.float32)
        xj_w = (h @ params["wj"][l]).astype(jnp.bfloat16).astype(jnp.float32)
        e_w = e @ params["we"][l] + params["wb"][l]
        z = xi_w[dst] + xj_w[src] + e_w
        msg = jax.nn.sigmoid(z[:, :f]) * jax.nn.softplus(z[:, f:])
        msg = msg.astype(jnp.bfloat16).astype(jnp.float32)
        agg = jnp.zeros_like(h).at[dst].add(msg)
        h = h + agg
        mean = h.mean(axis=0, keepdims=True)
        var = ((h - mean) ** 2).mean(axis=0, keepdims=True)
        h = (h - mean) / jnp.sqrt(var + bn_eps) * params["gamma"][l] + params["beta"][l]
        if l != n_conv - 1:
            h = jnp.maximum(h, 0.0)
    return h


if __name__ == "__main__":
    N_NODES, N_EDGES = 16, 32
    ORIG_ATOM_FEA, NBR_FEA, ATOM_FEA, N_CONV = 92, 41, 64, 3

    key = jax.random.PRNGKey(0)
    kx, ke, ks, kd = jax.random.split(key, 4)
    x = jax.random.normal(kx, (N_NODES, ORIG_ATOM_FEA), dtype=jnp.float32)
    edge_attr = jax.random.normal(ke, (N_EDGES, NBR_FEA), dtype=jnp.float32)
    src = jax.random.randint(ks, (N_EDGES,), 0, N_NODES, dtype=jnp.int32)
    dst = jax.random.randint(kd, (N_EDGES,), 0, N_NODES, dtype=jnp.int32)
    edge_index = jnp.stack([src, dst], axis=0)  # (2, E)

    params = init_params(jax.random.PRNGKey(42), ORIG_ATOM_FEA, NBR_FEA, ATOM_FEA, N_CONV)

    out = jax.block_until_ready(cgcnn_forward(params, x, edge_index, edge_attr))
    ref = jax.block_until_ready(cgcnn_reference(params, x, edge_index, edge_attr))

    assert out.shape == (N_NODES, ATOM_FEA)
    assert bool(jnp.all(jnp.isfinite(out)))
    # Loose tolerance: MXU summation order + bf16 rounding boundary differ slightly
    # from the XLA reference (and get amplified by 3x BatchNorm); structural bugs
    # (wrong gather direction, missing residual, wrong BN) produce O(1) errors.
    max_err = float(jnp.max(jnp.abs(out - ref)))
    assert max_err < 0.25, f"max |pallas - reference| = {max_err}"
    print("KERNEL_OK")
</pallas_src>

<mosaic_0001>
module attributes {stable_mosaic.version = 11 : i64} {
  func.func @_cgcnn_fused_kernel(%arg0: memref<16x92xf32, #tpu.memory_space<vmem>>, %arg1: memref<32x41xf32, #tpu.memory_space<vmem>>, %arg2: memref<32x1xi32, #tpu.memory_space<vmem>>, %arg3: memref<32x1xi32, #tpu.memory_space<vmem>>, %arg4: memref<1x32xi32, #tpu.memory_space<vmem>>, %arg5: memref<92x64xf32, #tpu.memory_space<vmem>>, %arg6: memref<1x64xf32, #tpu.memory_space<vmem>>, %arg7: memref<41x64xf32, #tpu.memory_space<vmem>>, %arg8: memref<1x64xf32, #tpu.memory_space<vmem>>, %arg9: memref<3x64x128xf32, #tpu.memory_space<vmem>>, %arg10: memref<3x64x128xf32, #tpu.memory_space<vmem>>, %arg11: memref<3x64x128xf32, #tpu.memory_space<vmem>>, %arg12: memref<3x1x128xf32, #tpu.memory_space<vmem>>, %arg13: memref<3x1x64xf32, #tpu.memory_space<vmem>>, %arg14: memref<3x1x64xf32, #tpu.memory_space<vmem>>, %arg15: memref<16x64xf32, #tpu.memory_space<vmem>>) attributes {dimension_semantics = [], scalar_prefetch = 0 : i64, scratch_operands = 0 : i64, tpu.core_type = #tpu.core_type<tc>} {
    %c0 = arith.constant 0 : index
    %c0_0 = arith.constant 0 : index
    %0 = vector.load %arg0[%c0, %c0_0] : memref<16x92xf32, #tpu.memory_space<vmem>>, vector<16x92xf32>
    %c0_1 = arith.constant 0 : index
    %c0_2 = arith.constant 0 : index
    %1 = vector.load %arg5[%c0_1, %c0_2] : memref<92x64xf32, #tpu.memory_space<vmem>>, vector<92x64xf32>
    %cst = arith.constant dense<0.000000e+00> : vector<16x64xf32>
    %2 = tpu.matmul %0, %1, %cst {dimension_numbers = #tpu.dot_dimension_numbers<[1], [0], [0], [1], [0, 0, 1, 1], [], []>} : vector<16x92xf32>, vector<92x64xf32>, vector<16x64xf32> -> vector<16x64xf32>
    %c0_3 = arith.constant 0 : index
    %c0_4 = arith.constant 0 : index
    %3 = vector.load %arg6[%c0_3, %c0_4] : memref<1x64xf32, #tpu.memory_space<vmem>>, vector<1x64xf32>
    %4 = vector.broadcast %3 : vector<1x64xf32> to vector<16x64xf32>
    %5 = arith.addf %2, %4 : vector<16x64xf32>
    %c0_5 = arith.constant 0 : index
    %c0_6 = arith.constant 0 : index
    %6 = vector.load %arg1[%c0_5, %c0_6] : memref<32x41xf32, #tpu.memory_space<vmem>>, vector<32x41xf32>
    %c0_7 = arith.constant 0 : index
    %c0_8 = arith.constant 0 : index
    %7 = vector.load %arg7[%c0_7, %c0_8] : memref<41x64xf32, #tpu.memory_space<vmem>>, vector<41x64xf32>
    %cst_9 = arith.constant dense<0.000000e+00> : vector<32x64xf32>
    %8 = tpu.matmul %6, %7, %cst_9 {dimension_numbers = #tpu.dot_dimension_numbers<[1], [0], [0], [1], [0, 0, 1, 1], [], []>} : vector<32x41xf32>, vector<41x64xf32>, vector<32x64xf32> -> vector<32x64xf32>
    %c0_10 = arith.constant 0 : index
    %c0_11 = arith.constant 0 : index
    %9 = vector.load %arg8[%c0_10, %c0_11] : memref<1x64xf32, #tpu.memory_space<vmem>>, vector<1x64xf32>
    %10 = vector.broadcast %9 : vector<1x64xf32> to vector<32x64xf32>
    %11 = arith.addf %8, %10 : vector<32x64xf32>
    %c0_12 = arith.constant 0 : index
    %c0_13 = arith.constant 0 : index
    %12 = vector.load %arg2[%c0_12, %c0_13] : memref<32x1xi32, #tpu.memory_space<vmem>>, vector<32x1xi32>
    %c0_14 = arith.constant 0 : index
    %c0_15 = arith.constant 0 : index
    %13 = vector.load %arg3[%c0_14, %c0_15] : memref<32x1xi32, #tpu.memory_space<vmem>>, vector<32x1xi32>
    %c0_16 = arith.constant 0 : index
    %c0_17 = arith.constant 0 : index
    %14 = vector.load %arg4[%c0_16, %c0_17] : memref<1x32xi32, #tpu.memory_space<vmem>>, vector<1x32xi32>
    %15 = tpu.iota {dimensions = array<i32: 1>} : vector<32x16xi32>
    %16 = tpu.iota {dimensions = array<i32: 0>} : vector<16x32xi32>
    %17 = vector.broadcast %12 : vector<32x1xi32> to vector<32x16xi32>
    %18 = arith.cmpi eq, %15, %17 : vector<32x16xi32>
    %19 = arith.extui %18 : vector<32x16xi1> to vector<32x16xi32>
    %20 = arith.sitofp %19 : vector<32x16xi32> to vector<32x16xf32>
    %21 = arith.truncf %20 : vector<32x16xf32> to vector<32x16xbf16>
    %22 = vector.broadcast %13 : vector<32x1xi32> to vector<32x16xi32>
    %23 = arith.cmpi eq, %15, %22 : vector<32x16xi32>
    %24 = arith.extui %23 : vector<32x16xi1> to vector<32x16xi32>
    %25 = arith.sitofp %24 : vector<32x16xi32> to vector<32x16xf32>
    %26 = arith.truncf %25 : vector<32x16xf32> to vector<32x16xbf16>
    %27 = vector.broadcast %14 : vector<1x32xi32> to vector<16x32xi32>
    %28 = arith.cmpi eq, %16, %27 : vector<16x32xi32>
    %29 = arith.extui %28 : vector<16x32xi1> to vector<16x32xi32>
    %30 = arith.sitofp %29 : vector<16x32xi32> to vector<16x32xf32>
    %31 = arith.truncf %30 : vector<16x32xf32> to vector<16x32xbf16>
    %c0_18 = arith.constant 0 : index
    %c0_19 = arith.constant 0 : index
    %c0_20 = arith.constant 0 : index
    %32 = vector.load %arg9[%c0_18, %c0_19, %c0_20] : memref<3x64x128xf32, #tpu.memory_space<vmem>>, vector<1x64x128xf32>
    %33 = vector.shape_cast %32 : vector<1x64x128xf32> to vector<64x128xf32>
    %c0_21 = arith.constant 0 : index
    %c0_22 = arith.constant 0 : index
    %c0_23 = arith.constant 0 : index
    %34 = vector.load %arg10[%c0_21, %c0_22, %c0_23] : memref<3x64x128xf32, #tpu.memory_space<vmem>>, vector<1x64x128xf32>
    %35 = vector.shape_cast %34 : vector<1x64x128xf32> to vector<64x128xf32>
    %c0_24 = arith.constant 0 : index
    %c0_25 = arith.constant 0 : index
    %c0_26 = arith.constant 0 : index
    %36 = vector.load %arg11[%c0_24, %c0_25, %c0_26] : memref<3x64x128xf32, #tpu.memory_space<vmem>>, vector<1x64x128xf32>
    %37 = vector.shape_cast %36 : vector<1x64x128xf32> to vector<64x128xf32>
    %c0_27 = arith.constant 0 : index
    %c0_28 = arith.constant 0 : index
    %c0_29 = arith.constant 0 : index
    %38 = vector.load %arg12[%c0_27, %c0_28, %c0_29] : memref<3x1x128xf32, #tpu.memory_space<vmem>>, vector<1x1x128xf32>
    %39 = vector.shape_cast %38 : vector<1x1x128xf32> to vector<1x128xf32>
    %cst_30 = arith.constant dense<0.000000e+00> : vector<16x128xf32>
    %40 = tpu.matmul %5, %33, %cst_30 {dimension_numbers = #tpu.dot_dimension_numbers<[1], [0], [0], [1], [0, 0, 1, 1], [], []>} : vector<16x64xf32>, vector<64x128xf32>, vector<16x128xf32> -> vector<16x128xf32>
    %cst_31 = arith.constant dense<0.000000e+00> : vector<16x128xf32>
    %41 = tpu.matmul %5, %35, %cst_31 {dimension_numbers = #tpu.dot_dimension_numbers<[1], [0], [0], [1], [0, 0, 1, 1], [], []>} : vector<16x64xf32>, vector<64x128xf32>, vector<16x128xf32> -> vector<16x128xf32>
    %cst_32 = arith.constant dense<0.000000e+00> : vector<32x128xf32>
    %42 = tpu.matmul %11, %37, %cst_32 {dimension_numbers = #tpu.dot_dimension_numbers<[1], [0], [0], [1], [0, 0, 1, 1], [], []>} : vector<32x64xf32>, vector<64x128xf32>, vector<32x128xf32> -> vector<32x128xf32>
    %43 = vector.broadcast %39 : vector<1x128xf32> to vector<32x128xf32>
    %44 = arith.addf %42, %43 : vector<32x128xf32>
    %45 = arith.truncf %40 : vector<16x128xf32> to vector<16x128xbf16>
    %cst_33 = arith.constant dense<0.000000e+00> : vector<32x128xf32>
    %46 = tpu.matmul %26, %45, %cst_33 {dimension_numbers = #tpu.dot_dimension_numbers<[1], [0], [0], [1], [0, 0, 1, 1], [], []>} : vector<32x16xbf16>, vector<16x128xbf16>, vector<32x128xf32> -> vector<32x128xf32>
    %47 = arith.truncf %41 : vector<16x128xf32> to vector<16x128xbf16>
    %cst_34 = arith.constant dense<0.000000e+00> : vector<32x128xf32>
    %48 = tpu.matmul %21, %47, %cst_34 {dimension_numbers = #tpu.dot_dimension_numbers<[1], [0], [0], [1], [0, 0, 1, 1], [], []>} : vector<32x16xbf16>, vector<16x128xbf16>, vector<32x128xf32> -> vector<32x128xf32>
    %49 = arith.addf %46, %48 : vector<32x128xf32>
    %50 = arith.addf %49, %44 : vector<32x128xf32>
    %51 = vector.extract_strided_slice %50 {offsets = [0, 0], sizes = [32, 64], strides = [1, 1]} : vector<32x128xf32> to vector<32x64xf32>
    %52 = arith.negf %51 : vector<32x64xf32>
    %53 = math.exp %52 : vector<32x64xf32>
    %cst_35 = arith.constant 1.000000e+00 : f32
    %54 = vector.broadcast %cst_35 : f32 to vector<32x64xf32>
    %55 = arith.addf %54, %53 : vector<32x64xf32>
    %56 = arith.divf %54, %55 : vector<32x64xf32>
    %57 = vector.extract_strided_slice %50 {offsets = [0, 64], sizes = [32, 64], strides = [1, 1]} : vector<32x128xf32> to vector<32x64xf32>
    %cst_36 = arith.constant 0.000000e+00 : f32
    %58 = vector.broadcast %cst_36 : f32 to vector<32x64xf32>
    %59 = arith.maximumf %57, %58 : vector<32x64xf32>
    %60 = vector.broadcast %cst_36 : f32 to vector<32x64xf32>
    %61 = arith.subf %57, %60 : vector<32x64xf32>
    %62 = arith.cmpf one, %61, %61 : vector<32x64xf32>
    %63 = vector.broadcast %cst_36 : f32 to vector<32x64xf32>
    %64 = arith.addf %57, %63 : vector<32x64xf32>
    %65 = math.absf %61 : vector<32x64xf32>
    %cst_37 = arith.constant 0.000000e+00 : f32
    %66 = vector.broadcast %cst_37 : f32 to vector<32x64xf32>
    %67 = arith.subf %66, %65 : vector<32x64xf32>
    %68 = math.exp %67 : vector<32x64xf32>
    %69 = math.log1p %68 : vector<32x64xf32>
    %70 = arith.addf %59, %69 : vector<32x64xf32>
    %71 = arith.select %62, %64, %70 : vector<32x64xi1>, vector<32x64xf32>
    %72 = arith.mulf %56, %71 : vector<32x64xf32>
    %73 = arith.truncf %72 : vector<32x64xf32> to vector<32x64xbf16>
    %cst_38 = arith.constant dense<0.000000e+00> : vector<16x64xf32>
    %74 = tpu.matmul %31, %73, %cst_38 {dimension_numbers = #tpu.dot_dimension_numbers<[1], [0], [0], [1], [0, 0, 1, 1], [], []>} : vector<16x32xbf16>, vector<32x64xbf16>, vector<16x64xf32> -> vector<16x64xf32>
    %75 = arith.addf %5, %74 : vector<16x64xf32>
    %cst_39 = arith.constant dense<0.000000e+00> : vector<64xf32>
    %76 = vector.multi_reduction <add>, %75, %cst_39 [0] : vector<16x64xf32> to vector<64xf32>
    %77 = vector.shape_cast %76 : vector<64xf32> to vector<1x64xf32>
    %cst_40 = arith.constant 1.600000e+01 : f32
    %78 = vector.broadcast %cst_40 : f32 to vector<1x64xf32>
    %79 = arith.divf %77, %78 : vector<1x64xf32>
    %80 = vector.broadcast %79 : vector<1x64xf32> to vector<16x64xf32>
    %81 = arith.subf %75, %80 : vector<16x64xf32>
    %82 = arith.mulf %81, %81 : vector<16x64xf32>
    %cst_41 = arith.constant dense<0.000000e+00> : vector<64xf32>
    %83 = vector.multi_reduction <add>, %82, %cst_41 [0] : vector<16x64xf32> to vector<64xf32>
    %84 = vector.shape_cast %83 : vector<64xf32> to vector<1x64xf32>
    %cst_42 = arith.constant 1.600000e+01 : f32
    %85 = vector.broadcast %cst_42 : f32 to vector<1x64xf32>
    %86 = arith.divf %84, %85 : vector<1x64xf32>
    %87 = vector.broadcast %79 : vector<1x64xf32> to vector<16x64xf32>
    %88 = arith.subf %75, %87 : vector<16x64xf32>
    %cst_43 = arith.constant 9.99999974E-6 : f32
    %89 = vector.broadcast %cst_43 : f32 to vector<1x64xf32>
    %90 = arith.addf %86, %89 : vector<1x64xf32>
    %91 = math.rsqrt %90 : vector<1x64xf32>
    %92 = vector.broadcast %91 : vector<1x64xf32> to vector<16x64xf32>
    %93 = arith.mulf %88, %92 : vector<16x64xf32>
    %c0_44 = arith.constant 0 : index
    %c0_45 = arith.constant 0 : index
    %c0_46 = arith.constant 0 : index
    %94 = vector.load %arg13[%c0_44, %c0_45, %c0_46] : memref<3x1x64xf32, #tpu.memory_space<vmem>>, vector<1x1x64xf32>
    %95 = vector.shape_cast %94 : vector<1x1x64xf32> to vector<1x64xf32>
    %96 = vector.broadcast %95 : vector<1x64xf32> to vector<16x64xf32>
    %97 = arith.mulf %93, %96 : vector<16x64xf32>
    %c0_47 = arith.constant 0 : index
    %c0_48 = arith.constant 0 : index
    %c0_49 = arith.constant 0 : index
    %98 = vector.load %arg14[%c0_47, %c0_48, %c0_49] : memref<3x1x64xf32, #tpu.memory_space<vmem>>, vector<1x1x64xf32>
    %99 = vector.shape_cast %98 : vector<1x1x64xf32> to vector<1x64xf32>
    %100 = vector.broadcast %99 : vector<1x64xf32> to vector<16x64xf32>
    %101 = arith.addf %97, %100 : vector<16x64xf32>
    %cst_50 = arith.constant 0.000000e+00 : f32
    %102 = vector.broadcast %cst_50 : f32 to vector<16x64xf32>
    %103 = arith.maximumf %101, %102 : vector<16x64xf32>
    %c1 = arith.constant 1 : index
    %c0_51 = arith.constant 0 : index
    %c0_52 = arith.constant 0 : index
    %104 = vector.load %arg9[%c1, %c0_51, %c0_52] : memref<3x64x128xf32, #tpu.memory_space<vmem>>, vector<1x64x128xf32>
    %105 = vector.shape_cast %104 : vector<1x64x128xf32> to vector<64x128xf32>
    %c1_53 = arith.constant 1 : index
    %c0_54 = arith.constant 0 : index
    %c0_55 = arith.constant 0 : index
    %106 = vector.load %arg10[%c1_53, %c0_54, %c0_55] : memref<3x64x128xf32, #tpu.memory_space<vmem>>, vector<1x64x128xf32>
    %107 = vector.shape_cast %106 : vector<1x64x128xf32> to vector<64x128xf32>
    %c1_56 = arith.constant 1 : index
    %c0_57 = arith.constant 0 : index
    %c0_58 = arith.constant 0 : index
    %108 = vector.load %arg11[%c1_56, %c0_57, %c0_58] : memref<3x64x128xf32, #tpu.memory_space<vmem>>, vector<1x64x128xf32>
    %109 = vector.shape_cast %108 : vector<1x64x128xf32> to vector<64x128xf32>
    %c1_59 = arith.constant 1 : index
    %c0_60 = arith.constant 0 : index
    %c0_61 = arith.constant 0 : index
    %110 = vector.load %arg12[%c1_59, %c0_60, %c0_61] : memref<3x1x128xf32, #tpu.memory_space<vmem>>, vector<1x1x128xf32>
    %111 = vector.shape_cast %110 : vector<1x1x128xf32> to vector<1x128xf32>
    %cst_62 = arith.constant dense<0.000000e+00> : vector<16x128xf32>
    %112 = tpu.matmul %103, %105, %cst_62 {dimension_numbers = #tpu.dot_dimension_numbers<[1], [0], [0], [1], [0, 0, 1, 1], [], []>} : vector<16x64xf32>, vector<64x128xf32>, vector<16x128xf32> -> vector<16x128xf32>
    %cst_63 = arith.constant dense<0.000000e+00> : vector<16x128xf32>
    %113 = tpu.matmul %103, %107, %cst_63 {dimension_numbers = #tpu.dot_dimension_numbers<[1], [0], [0], [1], [0, 0, 1, 1], [], []>} : vector<16x64xf32>, vector<64x128xf32>, vector<16x128xf32> -> vector<16x128xf32>
    %cst_64 = arith.constant dense<0.000000e+00> : vector<32x128xf32>
    %114 = tpu.matmul %11, %109, %cst_64 {dimension_numbers = #tpu.dot_dimension_numbers<[1], [0], [0], [1], [0, 0, 1, 1], [], []>} : vector<32x64xf32>, vector<64x128xf32>, vector<32x128xf32> -> vector<32x128xf32>
    %115 = vector.broadcast %111 : vector<1x128xf32> to vector<32x128xf32>
    %116 = arith.addf %114, %115 : vector<32x128xf32>
    %117 = arith.truncf %112 : vector<16x128xf32> to vector<16x128xbf16>
    %cst_65 = arith.constant dense<0.000000e+00> : vector<32x128xf32>
    %118 = tpu.matmul %26, %117, %cst_65 {dimension_numbers = #tpu.dot_dimension_numbers<[1], [0], [0], [1], [0, 0, 1, 1], [], []>} : vector<32x16xbf16>, vector<16x128xbf16>, vector<32x128xf32> -> vector<32x128xf32>
    %119 = arith.truncf %113 : vector<16x128xf32> to vector<16x128xbf16>
    %cst_66 = arith.constant dense<0.000000e+00> : vector<32x128xf32>
    %120 = tpu.matmul %21, %119, %cst_66 {dimension_numbers = #tpu.dot_dimension_numbers<[1], [0], [0], [1], [0, 0, 1, 1], [], []>} : vector<32x16xbf16>, vector<16x128xbf16>, vector<32x128xf32> -> vector<32x128xf32>
    %121 = arith.addf %118, %120 : vector<32x128xf32>
    %122 = arith.addf %121, %116 : vector<32x128xf32>
    %123 = vector.extract_strided_slice %122 {offsets = [0, 0], sizes = [32, 64], strides = [1, 1]} : vector<32x128xf32> to vector<32x64xf32>
    %124 = arith.negf %123 : vector<32x64xf32>
    %125 = math.exp %124 : vector<32x64xf32>
    %cst_67 = arith.constant 1.000000e+00 : f32
    %126 = vector.broadcast %cst_67 : f32 to vector<32x64xf32>
    %127 = arith.addf %126, %125 : vector<32x64xf32>
    %128 = arith.divf %126, %127 : vector<32x64xf32>
    %129 = vector.extract_strided_slice %122 {offsets = [0, 64], sizes = [32, 64], strides = [1, 1]} : vector<32x128xf32> to vector<32x64xf32>
    %cst_68 = arith.constant 0.000000e+00 : f32
    %130 = vector.broadcast %cst_68 : f32 to vector<32x64xf32>
    %131 = arith.maximumf %129, %130 : vector<32x64xf32>
    %132 = vector.broadcast %cst_68 : f32 to vector<32x64xf32>
    %133 = arith.subf %129, %132 : vector<32x64xf32>
    %134 = arith.cmpf one, %133, %133 : vector<32x64xf32>
    %135 = vector.broadcast %cst_68 : f32 to vector<32x64xf32>
    %136 = arith.addf %129, %135 : vector<32x64xf32>
    %137 = math.absf %133 : vector<32x64xf32>
    %cst_69 = arith.constant 0.000000e+00 : f32
    %138 = vector.broadcast %cst_69 : f32 to vector<32x64xf32>
    %139 = arith.subf %138, %137 : vector<32x64xf32>
    %140 = math.exp %139 : vector<32x64xf32>
    %141 = math.log1p %140 : vector<32x64xf32>
    %142 = arith.addf %131, %141 : vector<32x64xf32>
    %143 = arith.select %134, %136, %142 : vector<32x64xi1>, vector<32x64xf32>
    %144 = arith.mulf %128, %143 : vector<32x64xf32>
    %145 = arith.truncf %144 : vector<32x64xf32> to vector<32x64xbf16>
    %cst_70 = arith.constant dense<0.000000e+00> : vector<16x64xf32>
    %146 = tpu.matmul %31, %145, %cst_70 {dimension_numbers = #tpu.dot_dimension_numbers<[1], [0], [0], [1], [0, 0, 1, 1], [], []>} : vector<16x32xbf16>, vector<32x64xbf16>, vector<16x64xf32> -> vector<16x64xf32>
    %147 = arith.addf %103, %146 : vector<16x64xf32>
    %cst_71 = arith.constant dense<0.000000e+00> : vector<64xf32>
    %148 = vector.multi_reduction <add>, %147, %cst_71 [0] : vector<16x64xf32> to vector<64xf32>
    %149 = vector.shape_cast %148 : vector<64xf32> to vector<1x64xf32>
    %cst_72 = arith.constant 1.600000e+01 : f32
    %150 = vector.broadcast %cst_72 : f32 to vector<1x64xf32>
    %151 = arith.divf %149, %150 : vector<1x64xf32>
    %152 = vector.broadcast %151 : vector<1x64xf32> to vector<16x64xf32>
    %153 = arith.subf %147, %152 : vector<16x64xf32>
    %154 = arith.mulf %153, %153 : vector<16x64xf32>
    %cst_73 = arith.constant dense<0.000000e+00> : vector<64xf32>
    %155 = vector.multi_reduction <add>, %154, %cst_73 [0] : vector<16x64xf32> to vector<64xf32>
    %156 = vector.shape_cast %155 : vector<64xf32> to vector<1x64xf32>
    %cst_74 = arith.constant 1.600000e+01 : f32
    %157 = vector.broadcast %cst_74 : f32 to vector<1x64xf32>
    %158 = arith.divf %156, %157 : vector<1x64xf32>
    %159 = vector.broadcast %151 : vector<1x64xf32> to vector<16x64xf32>
    %160 = arith.subf %147, %159 : vector<16x64xf32>
    %cst_75 = arith.constant 9.99999974E-6 : f32
    %161 = vector.broadcast %cst_75 : f32 to vector<1x64xf32>
    %162 = arith.addf %158, %161 : vector<1x64xf32>
    %163 = math.rsqrt %162 : vector<1x64xf32>
    %164 = vector.broadcast %163 : vector<1x64xf32> to vector<16x64xf32>
    %165 = arith.mulf %160, %164 : vector<16x64xf32>
    %c1_76 = arith.constant 1 : index
    %c0_77 = arith.constant 0 : index
    %c0_78 = arith.constant 0 : index
    %166 = vector.load %arg13[%c1_76, %c0_77, %c0_78] : memref<3x1x64xf32, #tpu.memory_space<vmem>>, vector<1x1x64xf32>
    %167 = vector.shape_cast %166 : vector<1x1x64xf32> to vector<1x64xf32>
    %168 = vector.broadcast %167 : vector<1x64xf32> to vector<16x64xf32>
    %169 = arith.mulf %165, %168 : vector<16x64xf32>
    %c1_79 = arith.constant 1 : index
    %c0_80 = arith.constant 0 : index
    %c0_81 = arith.constant 0 : index
    %170 = vector.load %arg14[%c1_79, %c0_80, %c0_81] : memref<3x1x64xf32, #tpu.memory_space<vmem>>, vector<1x1x64xf32>
    %171 = vector.shape_cast %170 : vector<1x1x64xf32> to vector<1x64xf32>
    %172 = vector.broadcast %171 : vector<1x64xf32> to vector<16x64xf32>
    %173 = arith.addf %169, %172 : vector<16x64xf32>
    %cst_82 = arith.constant 0.000000e+00 : f32
    %174 = vector.broadcast %cst_82 : f32 to vector<16x64xf32>
    %175 = arith.maximumf %173, %174 : vector<16x64xf32>
    %c2 = arith.constant 2 : index
    %c0_83 = arith.constant 0 : index
    %c0_84 = arith.constant 0 : index
    %176 = vector.load %arg9[%c2, %c0_83, %c0_84] : memref<3x64x128xf32, #tpu.memory_space<vmem>>, vector<1x64x128xf32>
    %177 = vector.shape_cast %176 : vector<1x64x128xf32> to vector<64x128xf32>
    %c2_85 = arith.constant 2 : index
    %c0_86 = arith.constant 0 : index
    %c0_87 = arith.constant 0 : index
    %178 = vector.load %arg10[%c2_85, %c0_86, %c0_87] : memref<3x64x128xf32, #tpu.memory_space<vmem>>, vector<1x64x128xf32>
    %179 = vector.shape_cast %178 : vector<1x64x128xf32> to vector<64x128xf32>
    %c2_88 = arith.constant 2 : index
    %c0_89 = arith.constant 0 : index
    %c0_90 = arith.constant 0 : index
    %180 = vector.load %arg11[%c2_88, %c0_89, %c0_90] : memref<3x64x128xf32, #tpu.memory_space<vmem>>, vector<1x64x128xf32>
    %181 = vector.shape_cast %180 : vector<1x64x128xf32> to vector<64x128xf32>
    %c2_91 = arith.constant 2 : index
    %c0_92 = arith.constant 0 : index
    %c0_93 = arith.constant 0 : index
    %182 = vector.load %arg12[%c2_91, %c0_92, %c0_93] : memref<3x1x128xf32, #tpu.memory_space<vmem>>, vector<1x1x128xf32>
    %183 = vector.shape_cast %182 : vector<1x1x128xf32> to vector<1x128xf32>
    %cst_94 = arith.constant dense<0.000000e+00> : vector<16x128xf32>
    %184 = tpu.matmul %175, %177, %cst_94 {dimension_numbers = #tpu.dot_dimension_numbers<[1], [0], [0], [1], [0, 0, 1, 1], [], []>} : vector<16x64xf32>, vector<64x128xf32>, vector<16x128xf32> -> vector<16x128xf32>
    %cst_95 = arith.constant dense<0.000000e+00> : vector<16x128xf32>
    %185 = tpu.matmul %175, %179, %cst_95 {dimension_numbers = #tpu.dot_dimension_numbers<[1], [0], [0], [1], [0, 0, 1, 1], [], []>} : vector<16x64xf32>, vector<64x128xf32>, vector<16x128xf32> -> vector<16x128xf32>
    %cst_96 = arith.constant dense<0.000000e+00> : vector<32x128xf32>
    %186 = tpu.matmul %11, %181, %cst_96 {dimension_numbers = #tpu.dot_dimension_numbers<[1], [0], [0], [1], [0, 0, 1, 1], [], []>} : vector<32x64xf32>, vector<64x128xf32>, vector<32x128xf32> -> vector<32x128xf32>
    %187 = vector.broadcast %183 : vector<1x128xf32> to vector<32x128xf32>
    %188 = arith.addf %186, %187 : vector<32x128xf32>
    %189 = arith.truncf %184 : vector<16x128xf32> to vector<16x128xbf16>
    %cst_97 = arith.constant dense<0.000000e+00> : vector<32x128xf32>
    %190 = tpu.matmul %26, %189, %cst_97 {dimension_numbers = #tpu.dot_dimension_numbers<[1], [0], [0], [1], [0, 0, 1, 1], [], []>} : vector<32x16xbf16>, vector<16x128xbf16>, vector<32x128xf32> -> vector<32x128xf32>
    %191 = arith.truncf %185 : vector<16x128xf32> to vector<16x128xbf16>
    %cst_98 = arith.constant dense<0.000000e+00> : vector<32x128xf32>
    %192 = tpu.matmul %21, %191, %cst_98 {dimension_numbers = #tpu.dot_dimension_numbers<[1], [0], [0], [1], [0, 0, 1, 1], [], []>} : vector<32x16xbf16>, vector<16x128xbf16>, vector<32x128xf32> -> vector<32x128xf32>
    %193 = arith.addf %190, %192 : vector<32x128xf32>
    %194 = arith.addf %193, %188 : vector<32x128xf32>
    %195 = vector.extract_strided_slice %194 {offsets = [0, 0], sizes = [32, 64], strides = [1, 1]} : vector<32x128xf32> to vector<32x64xf32>
    %196 = arith.negf %195 : vector<32x64xf32>
    %197 = math.exp %196 : vector<32x64xf32>
    %cst_99 = arith.constant 1.000000e+00 : f32
    %198 = vector.broadcast %cst_99 : f32 to vector<32x64xf32>
    %199 = arith.addf %198, %197 : vector<32x64xf32>
    %200 = arith.divf %198, %199 : vector<32x64xf32>
    %201 = vector.extract_strided_slice %194 {offsets = [0, 64], sizes = [32, 64], strides = [1, 1]} : vector<32x128xf32> to vector<32x64xf32>
    %cst_100 = arith.constant 0.000000e+00 : f32
    %202 = vector.broadcast %cst_100 : f32 to vector<32x64xf32>
    %203 = arith.maximumf %201, %202 : vector<32x64xf32>
    %204 = vector.broadcast %cst_100 : f32 to vector<32x64xf32>
    %205 = arith.subf %201, %204 : vector<32x64xf32>
    %206 = arith.cmpf one, %205, %205 : vector<32x64xf32>
    %207 = vector.broadcast %cst_100 : f32 to vector<32x64xf32>
    %208 = arith.addf %201, %207 : vector<32x64xf32>
    %209 = math.absf %205 : vector<32x64xf32>
    %cst_101 = arith.constant 0.000000e+00 : f32
    %210 = vector.broadcast %cst_101 : f32 to vector<32x64xf32>
    %211 = arith.subf %210, %209 : vector<32x64xf32>
    %212 = math.exp %211 : vector<32x64xf32>
    %213 = math.log1p %212 : vector<32x64xf32>
    %214 = arith.addf %203, %213 : vector<32x64xf32>
    %215 = arith.select %206, %208, %214 : vector<32x64xi1>, vector<32x64xf32>
    %216 = arith.mulf %200, %215 : vector<32x64xf32>
    %217 = arith.truncf %216 : vector<32x64xf32> to vector<32x64xbf16>
    %cst_102 = arith.constant dense<0.000000e+00> : vector<16x64xf32>
    %218 = tpu.matmul %31, %217, %cst_102 {dimension_numbers = #tpu.dot_dimension_numbers<[1], [0], [0], [1], [0, 0, 1, 1], [], []>} : vector<16x32xbf16>, vector<32x64xbf16>, vector<16x64xf32> -> vector<16x64xf32>
    %219 = arith.addf %175, %218 : vector<16x64xf32>
    %cst_103 = arith.constant dense<0.000000e+00> : vector<64xf32>
    %220 = vector.multi_reduction <add>, %219, %cst_103 [0] : vector<16x64xf32> to vector<64xf32>
    %221 = vector.shape_cast %220 : vector<64xf32> to vector<1x64xf32>
    %cst_104 = arith.constant 1.600000e+01 : f32
    %222 = vector.broadcast %cst_104 : f32 to vector<1x64xf32>
    %223 = arith.divf %221, %222 : vector<1x64xf32>
    %224 = vector.broadcast %223 : vector<1x64xf32> to vector<16x64xf32>
    %225 = arith.subf %219, %224 : vector<16x64xf32>
    %226 = arith.mulf %225, %225 : vector<16x64xf32>
    %cst_105 = arith.constant dense<0.000000e+00> : vector<64xf32>
    %227 = vector.multi_reduction <add>, %226, %cst_105 [0] : vector<16x64xf32> to vector<64xf32>
    %228 = vector.shape_cast %227 : vector<64xf32> to vector<1x64xf32>
    %cst_106 = arith.constant 1.600000e+01 : f32
    %229 = vector.broadcast %cst_106 : f32 to vector<1x64xf32>
    %230 = arith.divf %228, %229 : vector<1x64xf32>
    %231 = vector.broadcast %223 : vector<1x64xf32> to vector<16x64xf32>
    %232 = arith.subf %219, %231 : vector<16x64xf32>
    %cst_107 = arith.constant 9.99999974E-6 : f32
    %233 = vector.broadcast %cst_107 : f32 to vector<1x64xf32>
    %234 = arith.addf %230, %233 : vector<1x64xf32>
    %235 = math.rsqrt %234 : vector<1x64xf32>
    %236 = vector.broadcast %235 : vector<1x64xf32> to vector<16x64xf32>
    %237 = arith.mulf %232, %236 : vector<16x64xf32>
    %c2_108 = arith.constant 2 : index
    %c0_109 = arith.constant 0 : index
    %c0_110 = arith.constant 0 : index
    %238 = vector.load %arg13[%c2_108, %c0_109, %c0_110] : memref<3x1x64xf32, #tpu.memory_space<vmem>>, vector<1x1x64xf32>
    %239 = vector.shape_cast %238 : vector<1x1x64xf32> to vector<1x64xf32>
    %240 = vector.broadcast %239 : vector<1x64xf32> to vector<16x64xf32>
    %241 = arith.mulf %237, %240 : vector<16x64xf32>
    %c2_111 = arith.constant 2 : index
    %c0_112 = arith.constant 0 : index
    %c0_113 = arith.constant 0 : index
    %242 = vector.load %arg14[%c2_111, %c0_112, %c0_113] : memref<3x1x64xf32, #tpu.memory_space<vmem>>, vector<1x1x64xf32>
    %243 = vector.shape_cast %242 : vector<1x1x64xf32> to vector<1x64xf32>
    %244 = vector.broadcast %243 : vector<1x64xf32> to vector<16x64xf32>
    %245 = arith.addf %241, %244 : vector<16x64xf32>
    %c0_114 = arith.constant 0 : index
    %c0_115 = arith.constant 0 : index
    %246 = vector.load %arg15[%c0_114, %c0_115] : memref<16x64xf32, #tpu.memory_space<vmem>>, vector<16x64xf32>
    tpu.vector_store %arg15[%c0_114, %c0_115], %245 {strides = array<i32>} : memref<16x64xf32, #tpu.memory_space<vmem>>, vector<16x64xf32>,
    return
  }
}

</mosaic_0001>

<bundles_post_ra>
// kernel: tpu_custom_call.1
= control target key start
LH: loop header
LB: loop body
LE: loop exit
PB: predicated region body
PF: predicated region fallthrough
CT: control target
= control target key end

     0   :  { %20 = vsyncpa [#allocation3], 0  ;;  %s3877_s0 = inlined_call_operand.vmem [shape: f32[16,92], index: 0, kind: input, shape index: {}]   ;;  %s3878_s1 = inlined_call_operand.hbm [shape: f32[32,41], index: 1, kind: input, shape index: {}]   ;;  %s3879_s2 = inlined_call_operand.vmem [shape: s32[32,1], index: 2, kind: input, shape index: {}]   ;;  %s3880_s3 = inlined_call_operand.vmem [shape: s32[32,1], index: 3, kind: input, shape index: {}]   ;;  %s3881_s4 = inlined_call_operand.vmem [shape: s32[1,32], index: 4, kind: input, shape index: {}]   ;;  %s3882_s5 = inlined_call_operand.vmem [shape: f32[92,64], index: 5, kind: input, shape index: {}]   ;;  %s3883_s6 = inlined_call_operand.hbm [shape: f32[1,64], index: 6, kind: input, shape index: {}]   ;;  %s3884_s7 = inlined_call_operand.vmem [shape: f32[41,64], index: 7, kind: input, shape index: {}]   ;;  %s3885_s8 = inlined_call_operand.hbm [shape: f32[1,64], index: 8, kind: input, shape index: {}]   ;;  %s3886_s9 = inlined_call_operand.vmem [shape: f32[3,64,128], index: 9, kind: input, shape index: {}]   ;;  %s3887_s10 = inlined_call_operand.hbm [shape: f32[3,64,128], index: 10, kind: input, shape index: {}]   ;;  %s3888_s11 = inlined_call_operand.hbm [shape: f32[3,64,128], index: 11, kind: input, shape index: {}]   ;;  %s3889_s12 = inlined_call_operand.vmem [shape: f32[3,1,128], index: 12, kind: input, shape index: {}]   ;;  %s3890_s13 = inlined_call_operand.vmem [shape: f32[3,1,64], index: 13, kind: input, shape index: {}]   ;;  %s3891_s14 = inlined_call_operand.vmem [shape: f32[3,1,64], index: 14, kind: input, shape index: {}]   ;;  %s3892_s15 = inlined_call_operand.hbm [shape: f32[16,64], index: 15, kind: output, shape index: {}]  }
   0x1   :  { %21 = vsyncpa [#allocation6], 0 }
   0x2   :  { %22 = vsyncpa [#allocation9], 0 }
   0x3   :  { %23 = vsyncpa [#allocation4], 0  ;;  %s3224_s18 = smov [#allocation5]   ;;  %s3084_s22 = scalar_lea.hbm %s3883_s6, 16 }
   0x4   :  { %s52_s19 = sshll.u32 %s3224_s18, 4  ;;  %p3085_p0 = scmp.ne.s32.totalorder %s3883_s6, %s3084_s22  ;;  %s53_s19 = int_to_ptr.vmem [resolvable:$true] %s52_s19 }
   0x5   :  { %p3088_p1 = scmp.lt.u32.totalorder %s3084_s22, %s3883_s6 }
   0x7   :  { %p3090_p2 = pnand %p3088_p1, %p3085_p0 }
   0x9   :  { %3093 = shalt.err (!%p3090_p2)
}
   0xa   :  { %s3094_s27 = scalar_lea.vmem %s53_s19, 16  ;;  %s3098_s28 = scalar_lea.vmem %s53_s19, 32 }
   0xb   :  { %p3095_p3 = scmp.ne.s32.totalorder %s53_s19, %s3094_s27  ;;  %p3099_p4 = scmp.lt.s32.totalorder %s53_s19, %s53_s19 }
   0xc   :  { %p3100_p5 = scmp.lt.s32.totalorder %s3098_s28, %s3094_s27 }
   0xe   :  { %p3101_p6 = por %p3100_p5, %p3099_p4 }
  0x10   :  { %p3102_p7 = pnand %p3101_p6, %p3095_p3 }
  0x12   :  { %3105 = shalt.err (!%p3102_p7)
}
  0x13   :  { %55 = dma.hbm_to_vmem [thread:$0]  %s3883_s6, 16, %s53_s19, [#allocation6]  }
  0x14   :  { %s3225_s16 = smov [#allocation8]   ;;  %s3226_s18 = smov [#allocation2]  }
  0x15   :  { %s75_s17 = sshll.u32 %s3225_s16, 4  ;;  %s31_s20 = sshll.u32 %s3226_s18, 4  ;;  %s76_s17 = int_to_ptr.vmem [resolvable:$true] %s75_s17  ;;  %s32_s20 = int_to_ptr.vmem [resolvable:$true] %s31_s20 }
  0x16   :  { %s3106_s23 = scalar_lea.hbm %s3887_s10, 3072 }
  0x17   :  { %p3107_p8 = scmp.ne.s32.totalorder %s3887_s10, %s3106_s23  ;;  %p3110_p9 = scmp.lt.u32.totalorder %s3106_s23, %s3887_s10 }
  0x19   :  { %p3112_p10 = pnand %p3110_p9, %p3107_p8 }
  0x1b   :  { %3115 = shalt.err (!%p3112_p10)
}
  0x1c   :  { %s3116_s6 = scalar_lea.vmem %s76_s17, 3072  ;;  %p3121_p12 = scmp.lt.s32.totalorder %s76_s17, %s76_s17 }
  0x1d   :  { %p3117_p11 = scmp.ne.s32.totalorder %s76_s17, %s3116_s6  ;;  %p3122_p13 = scmp.lt.s32.totalorder %s3116_s6, %s3116_s6 }
  0x1f   :  { %p3123_p0 = por %p3122_p13, %p3121_p12 }
  0x21   :  { %p3124_p1 = pnand %p3123_p0, %p3117_p11 }
  0x23   :  { %3127 = shalt.err (!%p3124_p1)
}
  0x24   :  { %s3227_s19 = smov 128   ;;  %s3228_s28 = smov 8  }
  0x25   :  { %81 = dma.hbm_to_vmem [thread:$0]  %s3887_s10, 3072, %s76_s17, [#allocation9], %s3227_s19, %s3227_s19, %s3228_s28  }
  0x26   :  { %s3128_s21 = scalar_lea.hbm %s3878_s1, 512 }
  0x27   :  { %p3129_p2 = scmp.ne.s32.totalorder %s3878_s1, %s3128_s21  ;;  %p3132_p3 = scmp.lt.u32.totalorder %s3128_s21, %s3878_s1 }
  0x29   :  { %p3134_p4 = pnand %p3132_p3, %p3129_p2 }
  0x2b   :  { %3137 = shalt.err (!%p3134_p4)
}
  0x2c   :  { %s3138_s26 = scalar_lea.vmem %s32_s20, 512  ;;  %p3143_p6 = scmp.lt.s32.totalorder %s32_s20, %s32_s20 }
  0x2d   :  { %p3139_p5 = scmp.ne.s32.totalorder %s32_s20, %s3138_s26  ;;  %p3144_p7 = scmp.lt.s32.totalorder %s3138_s26, %s3138_s26 }
  0x2f   :  { %p3145_p8 = por %p3144_p7, %p3143_p6 }
  0x31   :  { %p3146_p9 = pnand %p3145_p8, %p3139_p5 }
  0x33   :  { %3149 = shalt.err (!%p3146_p9)
}
  0x34   :  { %37 = dma.hbm_to_vmem [thread:$0]  %s3878_s1, 512, %s32_s20, [#allocation3], %s3227_s19, %s3227_s19, %s3228_s28  }
  0x35   :  { %s3229_s27 = smov [#allocation7]   ;;  %s3230_s29 = smov [#allocation10]  }
  0x36   :  { %s64_s6 = sshll.u32 %s3229_s27, 4  ;;  %s87_s30 = sshll.u32 %s3230_s29, 4  ;;  %s65_s6 = int_to_ptr.vmem [resolvable:$true] %s64_s6  ;;  %s88_s30 = int_to_ptr.vmem [resolvable:$true] %s87_s30 }
  0x37   :  { %s3150_s21 = scalar_lea.hbm %s3885_s8, 16 }
  0x38   :  { %p3151_p10 = scmp.ne.s32.totalorder %s3885_s8, %s3150_s21  ;;  %p3154_p11 = scmp.lt.u32.totalorder %s3150_s21, %s3885_s8 }
  0x3a   :  { %p3156_p12 = pnand %p3154_p11, %p3151_p10 }
  0x3c   :  { %3159 = shalt.err (!%p3156_p12)
}
  0x3d   :  { %s3160_s1 = scalar_lea.vmem %s65_s6, 16  ;;  %s3164_s20 = scalar_lea.vmem %s65_s6, 32 }
  0x3e   :  { %p3161_p13 = scmp.ne.s32.totalorder %s65_s6, %s3160_s1  ;;  %p3165_p0 = scmp.lt.s32.totalorder %s65_s6, %s65_s6 }
  0x3f   :  { %p3166_p1 = scmp.lt.s32.totalorder %s3164_s20, %s3160_s1 }
  0x41   :  { %p3167_p2 = por %p3166_p1, %p3165_p0 }
  0x43   :  { %p3168_p3 = pnand %p3167_p2, %p3161_p13 }
  0x45   :  { %3171 = shalt.err (!%p3168_p3)
}
  0x46   :  { %67 = dma.hbm_to_vmem [thread:$0]  %s3885_s8, 16, %s65_s6, [#allocation6]  }
  0x47   :  { %s3172_s29 = scalar_lea.hbm %s3888_s11, 3072 }
  0x48   :  { %p3173_p4 = scmp.ne.s32.totalorder %s3888_s11, %s3172_s29  ;;  %p3176_p5 = scmp.lt.u32.totalorder %s3172_s29, %s3888_s11 }
  0x4a   :  { %p3178_p6 = pnand %p3176_p5, %p3173_p4 }
  0x4c   :  { %3181 = shalt.err (!%p3178_p6)
}
  0x4d   :  { %s3182_s23 = scalar_lea.vmem %s88_s30, 3072  ;;  %p3187_p8 = scmp.lt.s32.totalorder %s88_s30, %s88_s30 }
  0x4e   :  { %p3183_p7 = scmp.ne.s32.totalorder %s88_s30, %s3182_s23  ;;  %p3188_p9 = scmp.lt.s32.totalorder %s3182_s23, %s3182_s23 }
  0x50   :  { %p3189_p10 = por %p3188_p9, %p3187_p8 }
  0x52   :  { %p3190_p11 = pnand %p3189_p10, %p3183_p7 }
  0x54   :  { %3193 = shalt.err (!%p3190_p11)
}
  0x55   :  { %93 = dma.hbm_to_vmem [thread:$0]  %s3888_s11, 3072, %s88_s30, [#allocation9], %s3227_s19, %s3227_s19, %s3228_s28  }
  0x56   :  { %3216 = dma.done.wait [#allocation3], 512  }
  0x57   :  { %3217 = vsyncadd [#allocation3], 4294966784 }
  0x58   :  { %3218 = dma.done.wait [#allocation6], 32  }
  0x59   :  { %3219 = vsyncadd [#allocation6], 4294967264 }
  0x5a   :  { %3220 = dma.done.wait [#allocation9], 6144  }
  0x5b   :  { %3221 = vsyncadd [#allocation9], 4294961152  ;;  %v118_v0 = vld [vmem:[%s3882_s5] sm:$0xff]  ;;  %v119_v1 = vld [vmem:[%s3882_s5 + $0x8] sm:$0xff]  ;;  %vm137_vm0 = vcmask 752640   ;;  %vm240_vm1 = vcmask 334848  }
  0x5c   :  { %v120_v2 = vld [vmem:[%s3882_s5 + $0x10] sm:$0xff]  ;;  %v2771_v3 = vpack.c.bf16 %v119_v1, %v118_v0  ;;  %v121_v4 = vld [vmem:[%s3882_s5 + $0x18] sm:$0xff]  ;;  %v122_v6 = vld [vmem:[%s3882_s5 + $0x20] sm:$0xff]  ;;  %vm253_vm2 = vcmask 1040384   ;;  %vm3231_vm3 = vmmov 1   ;;  %vm144_vm5 = vcmask 1043456  }
  0x5d   :  { %v2775_v5 = vpack.c.bf16 %v121_v4, %v120_v2  ;;  %v123_v7 = vld [vmem:[%s3882_s5 + $0x28] sm:$0xff]  ;;  %v116_v8 = vld [vmem:[%s3877_s0] sm:$0xff]  ;;  %v229_v12 = vld [vmem:[%s3884_s7 + $0x10] sm:$0xff]  ;;  %v3232_v61 = vmov 0   ;;  %vm444_vm7 = vcmask 523264   ;;  %vm706_vm10 = vcmask 130048  }
  0x5e   :  { %2772 = vmatprep.subr.bf16.mxu0 %v2771_v3  ;;  %v227_v9 = vld [vmem:[%s3884_s7] sm:$0xff]  ;;  %v2779_v10 = vpack.c.bf16 %v123_v7, %v122_v6  ;;  %2510 = vmatprep.mubr.msk.f32.mxu0 %vm137_vm0, %v116_v8  ;;  %v228_v11 = vld [vmem:[%s3884_s7 + $0x8] sm:$0xff]  ;;  %v230_v13 = vld [vmem:[%s3884_s7 + $0x18] sm:$0xff]  ;;  %s3235_s21 = smov 64   ;;  %s3236_s23 = smov [#allocation11]  }
  0x5f   :  { %2774 = vmatpush3.bf16.msra.mxu0 %v2771_v3  ;;  %v124_v14 = vld [vmem:[%s3882_s5 + $0x30] sm:$0xff]  ;;  %v125_v15 = vld [vmem:[%s3882_s5 + $0x38] sm:$0xff]  ;;  %v2797_v16 = vpack.c.bf16 %v228_v11, %v227_v9  ;;  %v2801_v17 = vpack.c.bf16 %v230_v13, %v229_v12  ;;  %v223_v18 = vld [vmem:[#allocation2] sm:$0xff]  ;;  %2981 = vset.pattern.permute.xlu1 %v3232_v61 }
  0x60   :  { %2776 = vmatprep.subr.bf16.mxu0 %v2775_v5  ;;  %v231_v19 = vld [vmem:[%s3884_s7 + $0x20] sm:$0xff]  ;;  %v232_v20 = vld [vmem:[%s3884_s7 + $0x28] sm:$0x1]  ;;  %2525 = vmatprep.mubr.msk.f32.mxu1 %vm240_vm1, %v223_v18  ;;  %v2783_v21 = vpack.c.bf16 %v125_v15, %v124_v14  ;;  %vm3440_vm4 = vmpackc.low %vm253_vm2, %vm3231_vm3 }
  0x61   :  { %2798 = vmatprep.subr.bf16.mxu1 %v2797_v16  ;;  %v126_v22 = vld [vmem:[%s3882_s5 + $0x40] sm:$0xff]  ;;  %v127_v23 = vld [vmem:[%s3882_s5 + $0x48] sm:$0xff]  ;;  %v2805_v24 = vpack.c.bf16 %v232_v20, %v231_v19  ;;  %v128_v29 = vld [vmem:[%s3882_s5 + $0x50] sm:$0xff]  ;;  %2980 = vset.pattern.permute.xlu0 %v3232_v61 }
  0x62   :  { %2800 = vmatpush3.bf16.msra.mxu1 %v2797_v16  ;;  %v419_v26 = vld [vmem:[%s3886_s9] sm:$0xff]  ;;  %v420_v27 = vld [vmem:[%s3886_s9 + $0x8] sm:$0xff]  ;;  %v2787_v28 = vpack.c.bf16 %v127_v23, %v126_v22  ;;  %v129_v30 = vld [vmem:[%s3882_s5 + $0x58] sm:$0xf] }
  0x63   :  { %2778 = vmatpush3.bf16.msra.mxu0 %v2775_v5  ;;  %2802 = vmatprep.subr.bf16.mxu1 %v2801_v17  ;;  %v2811_v31 = vpack.c.bf16 %v420_v27, %v419_v26  ;;  %v421_v32 = vld [vmem:[%s3886_s9 + $0x10] sm:$0xff]  ;;  %v422_v33 = vld [vmem:[%s3886_s9 + $0x18] sm:$0xff]  ;;  %v2791_v34 = vpack.c.bf16 %v129_v30, %v128_v29  ;;  %v224_v35 = vld [vmem:[#allocation2 + $0x8] sm:$0xff]  ;;  %v3233_v26 = vmov 0.0   ;;  %v351_v27 = vlaneseq }
  0x64   :  { %2780 = vmatprep.subr.bf16.mxu0 %v2779_v10  ;;  %vm3467_vm6 = vmpackc.low %vm144_vm5, %vm3231_vm3  ;;  %v427_v37 = vld [vmem:[#allocation8] sm:$0xff]  ;;  %v428_v38 = vld [vmem:[#allocation8 + $0x8] sm:$0xff]  ;;  %v2815_v39 = vpack.c.bf16 %v422_v33, %v421_v32 }
  0x65   :  { %v423_v40 = vld [vmem:[%s3886_s9 + $0x20] sm:$0xff]  ;;  %v424_v41 = vld [vmem:[%s3886_s9 + $0x28] sm:$0xff]  ;;  %v2827_v42 = vpack.c.bf16 %v428_v38, %v427_v37  ;;  %v429_v43 = vld [vmem:[#allocation8 + $0x10] sm:$0xff]  ;;  %v352_v29 = vand.u32 127, %v351_v27 }
  0x66   :  { %2804 = vmatpush3.bf16.msra.mxu1 %v2801_v17  ;;  %v430_v44 = vld [vmem:[#allocation8 + $0x18] sm:$0xff]  ;;  %v2819_v45 = vpack.c.bf16 %v424_v41, %v423_v40  ;;  %v117_v46 = vld [vmem:[%s3877_s0 + $0x8] sm:$0xff]  ;;  %v425_v51 = vld [vmem:[%s3886_s9 + $0x30] sm:$0xff] }
  0x67   :  { %2782 = vmatpush3.bf16.msra.mxu0 %v2779_v10  ;;  %2807 = vmatprep.subr.msk.bf16.mxu1 %vm3440_vm4, %v2805_v24  ;;  %v2831_v47 = vpack.c.bf16 %v430_v44, %v429_v43  ;;  %v431_v48 = vld [vmem:[#allocation8 + $0x20] sm:$0xff]  ;;  %v432_v49 = vld [vmem:[#allocation8 + $0x28] sm:$0xff]  ;;  %v426_v52 = vld [vmem:[%s3886_s9 + $0x38] sm:$0xff] }
  0x68   :  { %2784 = vmatprep.subr.bf16.mxu0 %v2783_v21  ;;  %v2835_v50 = vpack.c.bf16 %v432_v49, %v431_v48  ;;  %v433_v53 = vld [vmem:[#allocation8 + $0x30] sm:$0xff]  ;;  %v2823_v55 = vpack.c.bf16 %v426_v52, %v425_v51  ;;  %v434_v56 = vld [vmem:[#allocation8 + $0x38] sm:$0xff]  ;;  %v435_v62 = vld [vmem:[#allocation10] sm:$0xff] }
  0x69   :  { %v225_v54 = vld [vmem:[#allocation2 + $0x10] sm:$0xff]  ;;  %v226_v57 = vld [vmem:[#allocation2 + $0x18] sm:$0xff]  ;;  %v2839_v58 = vpack.c.bf16 %v434_v56, %v433_v53  ;;  %v342_v60 = vld [vmem:[%s3879_s2] sm:$0xff] }
  0x6a   :  { %2810 = vmatpush3.bf16.msk.msra.mxu1 %vm3440_vm4, %v2805_v24  ;;  %v344_v59 = vld [vmem:[%s3879_s2 + $0x10] sm:$0xff]  ;;  %357 = vperm.xlu0 %2980, %v342_v60   ;;  %v345_v63 = vld [vmem:[%s3879_s2 + $0x18] sm:$0xff]  ;;  %v343_v0 = vld [vmem:[%s3879_s2 + $0x8] sm:$0xff] }
  0x6b   :  { %2786 = vmatpush3.bf16.msra.mxu0 %v2783_v21  ;;  %2812 = vmatprep.subr.bf16.mxu1 %v2811_v31  ;;  %v436_v1 = vld [vmem:[#allocation10 + $0x8] sm:$0xff]  ;;  %v346_v4 = vld [vmem:[%s3880_s3] sm:$0xff]  ;;  %v349_v5 = vld [vmem:[%s3880_s3 + $0x18] sm:$0xff] }
  0x6c   :  { %2788 = vmatprep.subr.bf16.mxu0 %v2787_v28  ;;  %363 = vperm.xlu1 %2981, %v344_v59   ;;  %v2843_v2 = vpack.c.bf16 %v436_v1, %v435_v62  ;;  %v347_v3 = vld [vmem:[%s3880_s3 + $0x8] sm:$0xff]  ;;  %v348_v6 = vld [vmem:[%s3880_s3 + $0x10] sm:$0xff]  ;;  %v2236_v9 = vld [vmem:[#allocation5] ss:$0 sm:$0xff] }
  0x6d   :  { %2526 = vmatmul.mubr.msk.f32.vlgmr.msra.gmra.mrb[0].mxu1 %vm240_vm1, %v224_v35  ;;  %v2240_v10 = vld [vmem:[#allocation7] ss:$0 sm:$0xff]  ;;  %v437_v12 = vld [vmem:[#allocation10 + $0x10] sm:$0xff]  ;;  %v439_v19 = vld [vmem:[#allocation10 + $0x20] sm:$0xff] }
  0x6e   :  { %2814 = vmatpush3.bf16.msra.mxu1 %v2811_v31  ;;  %2528 = vmatprep.mubr.msk.f32.mxu1 %vm240_vm1, %v225_v54  ;;  %v438_v13 = vld [vmem:[#allocation10 + $0x18] sm:$0xff]  ;;  %v440_v20 = vld [vmem:[#allocation10 + $0x28] sm:$0xff]  ;;  %v441_v22 = vld [vmem:[#allocation10 + $0x30] sm:$0xff] }
  0x6f   :  { %2790 = vmatpush3.bf16.msra.mxu0 %v2787_v28  ;;  %2816 = vmatprep.subr.bf16.mxu1 %v2815_v39  ;;  %v2847_v18 = vpack.c.bf16 %v438_v13, %v437_v12  ;;  %v2851_v21 = vpack.c.bf16 %v440_v20, %v439_v19  ;;  %v442_v23 = vld [vmem:[#allocation10 + $0x38] sm:$0xff] }
  0x70   :  { %2793 = vmatprep.subr.msk.bf16.mxu0 %vm3467_vm6, %v2791_v34  ;;  %366 = vperm.xlu1 %2981, %v345_v63   ;;  %v2855_v24 = vpack.c.bf16 %v442_v23, %v441_v22  ;;  %v2261_v63 = vld [vmem:[%s3889_s12] ss:$0 sm:$0xff] }
  0x71   :  { %2529 = vmatmul.mubr.msk.f32.gmra.mrb[2].mxu1 %vm240_vm1, %v226_v57  ;;  %360 = vperm.xlu0 %2980, %v343_v0  }
  0x72   :  { %2818 = vmatpush3.bf16.msra.mxu1 %v2815_v39 }
  0x73   :  { %2796 = vmatpush3.bf16.msk.msra.mxu0 %vm3467_vm6, %v2791_v34  ;;  %2820 = vmatprep.subr.bf16.mxu1 %v2819_v45  ;;  %vm3234_vm6 = vmmov 0  }
  0x74   :  { %2828 = vmatprep.subr.bf16.mxu0 %v2827_v42  ;;  %386 = vperm.xlu1 %2981, %v347_v3  }
  0x75   :  { %383 = vperm.xlu0 %2980, %v346_v4  }
  0x76   :  { %2511 = vmatmul.mubr.msk.f32.vlgmr.msra.gmra.mrb[0].mxu0 %vm137_vm0, %v117_v46  ;;  %2822 = vmatpush3.bf16.msra.mxu1 %v2819_v45 }
  0x77   :  { %2830 = vmatpush3.bf16.msra.mxu0 %v2827_v42  ;;  %2824 = vmatprep.subr.bf16.mxu1 %v2823_v55 }
  0x78   :  { %2832 = vmatprep.subr.bf16.mxu0 %v2831_v47  ;;  %392 = vperm.xlu1 %2981, %v349_v5  }
  0x79   :  { %389 = vperm.xlu0 %2980, %v348_v6  }
  0x7a   :  { %2826 = vmatpush3.bf16.msra.mxu1 %v2823_v55 }
  0x7b   :  { %2834 = vmatpush3.bf16.msra.mxu0 %v2831_v47  ;;  %2844 = vmatprep.subr.bf16.mxu1 %v2843_v2 }
  0x7c   :  { %2836 = vmatprep.subr.bf16.mxu0 %v2835_v50 }
  0x7f   :  { %2838 = vmatpush3.bf16.msra.mxu0 %v2835_v50 }
  0x80   :  { %2840 = vmatprep.subr.bf16.mxu0 %v2839_v58 }
  0x83   :  { %2842 = vmatpush3.bf16.msra.mxu0 %v2839_v58 }
  0xe9   :  { %v358_v28 = vpop.permute.xlu0 %357 }
  0xea   :  { %vm368_vm8 = vcmp.eq.s32.totalorder %v352_v29, %v358_v28 }
  0xeb   :  { %v2246_v31 = vsel %vm368_vm8, 1.0, %v3233_v26  ;;  %v364_v38 = vpop.permute.xlu1 %363 }
  0xec   :  { %vm370_vm11 = vcmp.eq.s32.totalorder %v352_v29, %v364_v38 }
  0xed   :  { %v2248_v48 = vsel %vm370_vm11, 1.0, %v3233_v26 }
  0xef   :  { %v367_v39 = vpop.permute.xlu1 %366 }
  0xf0   :  { %v361_v30 = vpop.permute.xlu0 %360  ;;  %vm371_vm12 = vcmp.eq.s32.totalorder %v352_v29, %v367_v39 }
  0xf1   :  { %vm369_vm9 = vcmp.eq.s32.totalorder %v352_v29, %v361_v30  ;;  %v2249_v49 = vsel %vm371_vm12, 1.0, %v3233_v26 }
  0xf2   :  { %v2247_v32 = vsel %vm369_vm9, 1.0, %v3233_v26  ;;  %v3558_v52 = vpack.c.bf16 %v2249_v49, %v2248_v48 }
  0xf3   :  { %v3546_v37 = vpack.c.bf16 %v2247_v32, %v2246_v31  ;;  %v387_v40 = vpop.permute.xlu1 %386 }
  0xf4   :  { %v384_v41 = vpop.permute.xlu0 %383  ;;  %vm395_vm13 = vcmp.eq.s32.totalorder %v352_v29, %v387_v40 }
  0xf5   :  { %vm394_vm14 = vcmp.eq.s32.totalorder %v352_v29, %v384_v41  ;;  %v2251_v50 = vsel %vm395_vm13, 1.0, %v3233_v26 }
  0xf6   :  { %v2250_v51 = vsel %vm394_vm14, 1.0, %v3233_v26  ;;  %vm939_vm14 = vcmask 261120  }
  0xf7   :  { %v3560_v53 = vpack.c.bf16 %v2251_v50, %v2250_v51  ;;  %v393_v54 = vpop.permute.xlu1 %392 }
  0xf8   :  { %v390_v55 = vpop.permute.xlu0 %389  ;;  %vm397_vm15 = vcmp.eq.s32.totalorder %v352_v29, %v393_v54 }
  0xf9   :  { %vm396_vm0 = vcmp.eq.s32.totalorder %v352_v29, %v390_v55  ;;  %v2253_v56 = vsel %vm397_vm15, 1.0, %v3233_v26 }
  0xfa   :  { %v2252_v57 = vsel %vm396_vm0, 1.0, %v3233_v26 }
  0xfb   :  { %v3568_v60 = vpack.c.bf16 %v2253_v56, %v2252_v57 }
 0x140   :  { %v2527_v7 = vpop.f32.mrb[0].mxu1 }
 0x141   :  { %v323_v8 = vpop.f32.mrb[1].mxu1  ;;  %v3534_v25 = vadd.f32 %v2527_v7, %v2240_v10 }
 0x142   :  { %v3520_v16 = vadd.f32 %v2240_v10, %v323_v8 }
 0x144   :  { %v2530_v33 = vpop.f32.mrb[2].mxu1 }
 0x145   :  { %v3542_v34 = vadd.f32 %v2530_v33, %v2240_v10  ;;  %v333_v35 = vpop.f32.mrb[3].mxu1 }
 0x146   :  { %v3544_v36 = vadd.f32 %v2240_v10, %v333_v35 }
 0x149   :  { %v2512_v11 = vpop.f32.mrb[0].mxu0 }
 0x14a   :  { %v214_v14 = vpop.f32.mrb[1].mxu0  ;;  %v3522_v17 = vadd.f32 %v2512_v11, %v2236_v9 }
 0x14b   :  { %v3518_v15 = vadd.f32 %v2236_v9, %v214_v14 }
 0x14d   :  { %2547 = vmatprep.mubr.msk.f32.mxu1 %vm444_vm7, %v3518_v15  ;;  %2566 = vmatprep.mubr.msk.f32.mxu0 %vm444_vm7, %v3518_v15 }
 0x14e   :  { %2548 = vmatmul.mubr.msk.f32.vlgmr.msra.gmra.mrb[4].mxu1 %vm444_vm7, %v3522_v17  ;;  %2567 = vmatmul.mubr.msk.f32.vlgmr.msra.gmra.mrb[2].mxu0 %vm444_vm7, %v3522_v17 }
 0x14f   :  { %2846 = vmatpush3.bf16.msra.mxu1 %v2843_v2  ;;  %2585 = vmatprep.mubr.msk.f32.mxu1 %vm444_vm7, %v3520_v16 }
 0x150   :  { %2848 = vmatprep.subr.bf16.mxu1 %v2847_v18  ;;  %2593 = vmatprep.mubr.msk.bf16.mxu0 %vm706_vm10, %v3546_v37 }
 0x153   :  { %2850 = vmatpush3.bf16.msra.mxu1 %v2847_v18 }
 0x154   :  { %2852 = vmatprep.subr.bf16.mxu1 %v2851_v21 }
 0x157   :  { %2854 = vmatpush3.bf16.msra.mxu1 %v2851_v21 }
 0x158   :  { %2856 = vmatprep.subr.bf16.mxu1 %v2855_v24 }
 0x15b   :  { %2858 = vmatpush3.bf16.msra.mxu1 %v2855_v24 }
 0x15c   :  { %2603 = vmatprep.subr.bf16.mxu1 %v3233_v26 }
 0x15e   :  { %2586 = vmatmul.mubr.msk.f32.vlgmr.msra.gmra.mrb[6].mxu1 %vm444_vm7, %v3534_v25 }
 0x15f   :  { %2588 = vmatprep.mubr.msk.f32.mxu1 %vm444_vm7, %v3544_v36 }
 0x162   :  { %2589 = vmatmul.mubr.msk.f32.gmra.mrb[8].mxu1 %vm444_vm7, %v3542_v34 }
 0x163   :  { %2607 = vmatprep.mubr.msk.bf16.mxu1 %vm3234_vm6, %v3233_v26 }
 0x221   :  { %v2549_v42 = vpop.f32.mrb[4].mxu1  ;;  %v2568_v43 = vpop.f32.mrb[2].mxu0 }
 0x222   :  { %v517_v44 = vpop.f32.mrb[5].mxu1  ;;  %v592_v45 = vpop.f32.mrb[3].mxu0 }
 0x223   :  { %v704_v46 = vpack.c.bf16 %v2549_v42, %v517_v44  ;;  %v705_v47 = vpack.c.bf16 %v2568_v43, %v592_v45 }
 0x225   :  { %2591 = vmatprep.subr.bf16.mxu0 %v705_v47 }
 0x226   :  { %2592 = vmatpush3.bf16.msra.mxu0 %v705_v47 }
 0x227   :  { %2597 = vmatprep.subr.bf16.mxu0 %v704_v46 }
 0x229   :  { %2594 = vmatmul.mubr.msk.bf16.vlgmr.msra.gmra.mrb[4].mxu0 %vm706_vm10, %v3558_v52 }
 0x22a   :  { %2598 = vmatpush3.bf16.msra.mxu0 %v704_v46  ;;  %2599 = vmatprep.mubr.msk.bf16.mxu0 %vm706_vm10, %v3560_v53 }
 0x231   :  { %v2587_v58 = vpop.f32.mrb[6].mxu1 }
 0x232   :  { %v685_v59 = vpop.f32.mrb[7].mxu1  ;;  %v691_v6 = vadd.f32 %v2587_v58, %v2261_v63 }
 0x233   :  { %v686_v1 = vadd.f32 %v2261_v63, %v685_v59 }
 0x235   :  { %2600 = vmatmul.mubr.msk.bf16.vlgmr.msra.gmra.mrb[4].mxu0 %vm706_vm10, %v3568_v60  ;;  %v2590_v61 = vpop.f32.mrb[8].mxu1 }
 0x236   :  { %v695_v62 = vpop.f32.mrb[9].mxu1  ;;  %v701_v3 = vadd.f32 %v2590_v61, %v2261_v63 }
 0x237   :  { %v696_v0 = vadd.f32 %v2261_v63, %v695_v62 }
 0x308   :  { %v2601_v2 = vpop.f32.mrb[4].mxu0 }
 0x309   :  { %v3575_v4 = vadd.f32 %v2601_v2, %v696_v0  ;;  %v802_v5 = vpop.f32.mrb[5].mxu0 }
 0x30a   :  { %v3577_v7 = vadd.f32 %v802_v5, %v686_v1  ;;  %v2602_v8 = vpop.f32.mrb[6].mxu0  ;;  %v1046_v5 = vld [vmem:[#allocation8 + $0x48] sm:$0xff] }
 0x30b   :  { %v859_v9 = vand.u32 2147483647, %v3575_v4  ;;  %v3580_v10 = vadd.f32 %v2602_v8, %v701_v3  ;;  %v805_v11 = vpop.f32.mrb[7].mxu0  ;;  %v847_v54 = vmax.f32 %v3575_v4, 0.0  ;;  %vm851_vm9 = vcmp.ne.f32.partialorder %v3575_v4, %v3575_v4 }
 0x30c   :  { %v857_v12 = vand.u32 2147483647, %v3577_v7  ;;  %v3583_v13 = vadd.f32 %v805_v11, %v691_v6  ;;  %v845_v51 = vmax.f32 %v3577_v7, 0.0  ;;  %vm849_vm5 = vcmp.ne.f32.partialorder %v3577_v7, %v3577_v7 }
 0x30d   :  { %v863_v14 = vsub.f32 0.0, %v859_v9  ;;  %v860_v18 = vand.u32 2147483647, %v3580_v10  ;;  %vm852_vm11 = vcmp.ne.f32.partialorder %v3580_v10, %v3580_v10 }
 0x30e   :  { %v861_v19 = vsub.f32 0.0, %v857_v12  ;;  %v858_v20 = vand.u32 2147483647, %v3583_v13  ;;  %v846_v0 = vmax.f32 %v3583_v13, 0.0  ;;  %vm850_vm8 = vcmp.ne.f32.partialorder %v3583_v13, %v3583_v13 }
 0x30f   :  { %v869_v21 = vmul.f32 1.442695, %v863_v14  ;;  %v864_v22 = vsub.f32 0.0, %v860_v18 }
 0x310   :  { %v865_v23 = vmul.f32 1.442695, %v861_v19  ;;  %v862_v24 = vsub.f32 0.0, %v858_v20 }
 0x311   :  { %2982 = vpow2.f32 %v869_v21  ;;  %v871_v28 = vmul.f32 1.442695, %v864_v22 }
 0x312   :  { %2984 = vpow2.f32 %v865_v23  ;;  %v867_v29 = vmul.f32 1.442695, %v862_v24  ;;  %v848_v23 = vmax.f32 %v3580_v10, 0.0 }
 0x313   :  { %2986 = vpow2.f32 %v871_v28 }
 0x314   :  { %2988 = vpow2.f32 %v867_v29 }
 0x31b   :  { %v2983_v30 = vpop.eup %2982 }
 0x31c   :  { %v2985_v31 = vpop.eup %2984  ;;  %v891_v32 = vadd.f32 1.0, %v2983_v30  ;;  %v894_v42 = vmul.f32 -0.5, %v2983_v30  ;;  %v897_v49 = vand.u32 2147483647, %v2983_v30 }
 0x31d   :  { %v2987_v33 = vpop.eup %2986  ;;  %v873_v35 = vadd.f32 1.0, %v2985_v31  ;;  %v876_v41 = vmul.f32 -0.5, %v2985_v31  ;;  %v879_v47 = vand.u32 2147483647, %v2985_v31 }
 0x31e   :  { %v2989_v38 = vpop.eup %2988  ;;  %2990 = vlog2.f32 %v891_v32  ;;  %v900_v39 = vadd.f32 1.0, %v2987_v33  ;;  %v903_v44 = vmul.f32 -0.5, %v2987_v33  ;;  %v895_v46 = vadd.f32 1.0, %v894_v42 }
 0x31f   :  { %2992 = vlog2.f32 %v873_v35  ;;  %v882_v40 = vadd.f32 1.0, %v2989_v38  ;;  %v885_v43 = vmul.f32 -0.5, %v2989_v38  ;;  %v877_v45 = vadd.f32 1.0, %v876_v41 }
 0x320   :  { %2994 = vlog2.f32 %v900_v39  ;;  %v904_v55 = vadd.f32 1.0, %v903_v44  ;;  %v888_v57 = vand.u32 2147483647, %v2989_v38  ;;  %v906_v59 = vand.u32 2147483647, %v2987_v33 }
 0x321   :  { %2996 = vlog2.f32 %v882_v40  ;;  %v886_v48 = vadd.f32 1.0, %v885_v43  ;;  %v878_v63 = vmul.f32 %v2985_v31, %v877_v45  ;;  %v896_v1 = vmul.f32 %v2983_v30, %v895_v46  ;;  %v2254_v46 = vld [vmem:[%s3881_s4] ss:$0 sm:$0xff]  ;;  %s2222_s4 = sshll.u32 %s3236_s23, 4  ;;  %s2223_s4 = int_to_ptr.vmem [resolvable:$true] %s2222_s4 }
 0x322   :  { %vm880_vm1 = vcmp.lt.f32.partialorder %v879_v47, 0.0004427343  ;;  %vm3590_vm2 = vcmp.lt.f32.partialorder %v897_v49, 0.0004427343  ;;  %v905_v12 = vmul.f32 %v2987_v33, %v904_v55  ;;  %vm889_vm3 = vcmp.lt.f32.partialorder %v888_v57, 0.0004427343  ;;  %p3199_p13 = scmp.lt.s32.totalorder %s2223_s4, %s2223_s4 }
 0x323   :  { %v887_v3 = vmul.f32 %v2989_v38, %v886_v48  ;;  %vm907_vm4 = vcmp.lt.f32.partialorder %v906_v59, 0.0004427343  ;;  %v2270_v31 = vmul.f32 -1.442695, %v3577_v7  ;;  %v2271_v32 = vmul.f32 -1.442695, %v3583_v13 }
 0x324   :  { %v2272_v33 = vmul.f32 -1.442695, %v3575_v4  ;;  %v2273_v35 = vmul.f32 -1.442695, %v3580_v10  ;;  %s3194_s0 = scalar_lea.vmem %s2223_s4, 256 }
 0x325   :  { %2998 = vpow2.f32 %v2270_v31  ;;  %p3195_p12 = scmp.ne.s32.totalorder %s2223_s4, %s3194_s0  ;;  %p3200_p0 = scmp.lt.s32.totalorder %s3194_s0, %s3194_s0 }
 0x326   :  { %3000 = vpow2.f32 %v2271_v32  ;;  %v1052_v32 = vld [vmem:[#allocation8 + $0x78] sm:$0xff] }
 0x327   :  { %3002 = vpow2.f32 %v2272_v33  ;;  %p3201_p1 = por %p3200_p0, %p3199_p13 }
 0x328   :  { %v2991_v50 = vpop.eup %2990  ;;  %3004 = vpow2.f32 %v2273_v35  ;;  %v1054_v35 = vld [vmem:[#allocation10 + $0x40] sm:$0xff] }
 0x329   :  { %v2993_v56 = vpop.eup %2992  ;;  %v893_v58 = vmul.f32 0.6931472, %v2991_v50  ;;  %p3202_p2 = pnand %p3201_p1, %p3195_p12 }
 0x32a   :  { %v2995_v61 = vpop.eup %2994  ;;  %v875_v62 = vmul.f32 0.6931472, %v2993_v56 }
 0x32b   :  { %v2997_v2 = vpop.eup %2996  ;;  %v902_v6 = vmul.f32 0.6931472, %v2995_v61  ;;  %v899_v11 = vsel %vm3590_vm2, %v896_v1, %v893_v58  ;;  %v2278_v1 = vld [vmem:[%s3886_s9 + $0x48] sm:$0xff] }
 0x32c   :  { %v881_v8 = vsel %vm880_vm1, %v878_v63, %v875_v62  ;;  %v884_v9 = vmul.f32 0.6931472, %v2997_v2  ;;  %v911_v22 = vadd.f32 %v899_v11, %v847_v54 }
 0x32d   :  { %v909_v14 = vadd.f32 %v881_v8, %v845_v51  ;;  %v908_v19 = vsel %vm907_vm4, %v905_v12, %v902_v6  ;;  %v2279_v8 = vld [vmem:[%s3886_s9 + $0x50] sm:$0xff] }
 0x32e   :  { %v890_v18 = vsel %vm889_vm3, %v887_v3, %v884_v9  ;;  %v912_v28 = vadd.f32 %v908_v19, %v848_v23  ;;  %v915_v29 = vsel %vm851_vm9, %v3575_v4, %v911_v22  ;;  %v354_v4 = vshrl.u32 %v351_v27, 7  ;;  %v1045_v3 = vld [vmem:[#allocation8 + $0x40] sm:$0xff]  ;;  %v2280_v9 = vld [vmem:[%s3886_s9 + $0x58] sm:$0xff]  ;;  %v1050_v23 = vld [vmem:[#allocation8 + $0x68] sm:$0xff] }
 0x32f   :  { %v913_v20 = vsel %vm849_vm5, %v3577_v7, %v909_v14  ;;  %v910_v21 = vadd.f32 %v890_v18, %v846_v0  ;;  %v2999_v38 = vpop.eup %2998  ;;  %v2277_v0 = vld [vmem:[%s3886_s9 + $0x40] sm:$0xff]  ;;  %v2875_v6 = vpack.c.bf16 %v1046_v5, %v1045_v3  ;;  %v2863_v11 = vpack.c.bf16 %v2280_v9, %v2279_v8  ;;  %v1047_v12 = vld [vmem:[#allocation8 + $0x50] sm:$0xff] }
 0x330   :  { %921 = vrot.lane.b32.xlu0 %v913_v20, %s3235_s21  ;;  %v916_v30 = vsel %vm852_vm11, %v3580_v10, %v912_v28  ;;  %v3001_v39 = vpop.eup %3000  ;;  %v833_v40 = vadd.f32 1.0, %v2999_v38  ;;  %v355_v45 = vadd.s32 8, %v354_v4  ;;  %vm412_vm12 = vcmp.eq.s32.totalorder %v354_v4, %v2254_v46  ;;  %v1048_v14 = vld [vmem:[#allocation8 + $0x58] sm:$0xff]  ;;  %v2282_v20 = vld [vmem:[%s3886_s9 + $0x68] sm:$0xff]  ;;  %v2283_v28 = vld [vmem:[%s3886_s9 + $0x70] sm:$0xff] }
 0x331   :  { %v914_v24 = vsel %vm850_vm8, %v3583_v13, %v910_v21  ;;  %v3003_v41 = vpop.eup %3002  ;;  %v834_v42 = vadd.f32 1.0, %v3001_v39  ;;  %v2255_v59 = vsel %vm412_vm12, 1.0, %v3233_v26  ;;  %v2859_v2 = vpack.c.bf16 %v2278_v1, %v2277_v0  ;;  %v2281_v19 = vld [vmem:[%s3886_s9 + $0x60] sm:$0xff]  ;;  %v1055_v38 = vld [vmem:[#allocation10 + $0x48] sm:$0xff] }
 0x332   :  { %923 = vrot.lane.b32.xlu1 %v914_v24, %s3235_s21  ;;  %v3005_v43 = vpop.eup %3004  ;;  %3006 = vrcp.f32 %v833_v40  ;;  %v835_v44 = vadd.f32 1.0, %v3003_v41  ;;  %vm413_vm13 = vcmp.eq.s32.totalorder %v355_v45, %v2254_v46  ;;  %v2879_v18 = vpack.c.bf16 %v1048_v14, %v1047_v12  ;;  %v1049_v22 = vld [vmem:[#allocation8 + $0x60] sm:$0xff] }
 0x333   :  { %3008 = vrcp.f32 %v834_v42  ;;  %v836_v7 = vadd.f32 1.0, %v3005_v43  ;;  %v2256_v61 = vsel %vm413_vm13, 1.0, %v3233_v26  ;;  %2860 = vmatprep.subr.bf16.mxu0 %v2859_v2  ;;  %v2867_v21 = vpack.c.bf16 %v2282_v20, %v2281_v19  ;;  %v1056_v20 = vld [vmem:[#allocation10 + $0x50] sm:$0xff] }
 0x334   :  { %925 = vrot.lane.b32.xlu0 %v915_v29, %s3235_s21  ;;  %3010 = vrcp.f32 %v835_v44  ;;  %v3626_v63 = vpack.c.bf16 %v2256_v61, %v2255_v59  ;;  %2862 = vmatpush3.bf16.msra.mxu0 %v2859_v2  ;;  %v2883_v24 = vpack.c.bf16 %v1050_v23, %v1049_v22  ;;  %v2284_v29 = vld [vmem:[%s3886_s9 + $0x78] sm:$0xff]  ;;  %v2891_v39 = vpack.c.bf16 %v1055_v38, %v1054_v35 }
 0x335   :  { %3012 = vrcp.f32 %v836_v7  ;;  %2864 = vmatprep.subr.bf16.mxu0 %v2863_v11  ;;  %v2871_v31 = vpack.c.bf16 %v2284_v29, %v2283_v28  ;;  %v1058_v28 = vld [vmem:[#allocation10 + $0x60] sm:$0xff]  ;;  %v1059_v29 = vld [vmem:[#allocation10 + $0x68] sm:$0xff] }
 0x336   :  { %927 = vrot.lane.b32.xlu1 %v916_v30, %s3235_s21  ;;  %v1051_v30 = vld [vmem:[#allocation8 + $0x70] sm:$0xff] }
 0x337   :  { %v2887_v33 = vpack.c.bf16 %v1052_v32, %v1051_v30  ;;  %v2899_v30 = vpack.c.bf16 %v1059_v29, %v1058_v28  ;;  %v1061_v32 = vld [vmem:[#allocation10 + $0x78] sm:$0xff] }
 0x338   :  { %2866 = vmatpush3.bf16.msra.mxu0 %v2863_v11  ;;  %v2276_v11 = vld [vmem:[%s3891_s14] ss:$0 sm:$0xff] }
 0x339   :  { %2868 = vmatprep.subr.bf16.mxu0 %v2867_v21 }
 0x33c   :  { %v3007_v10 = vpop.eup %3006  ;;  %2870 = vmatpush3.bf16.msra.mxu0 %v2867_v21  ;;  %v1057_v21 = vld [vmem:[#allocation10 + $0x58] sm:$0xff] }
 0x33d   :  { %v3009_v47 = vpop.eup %3008  ;;  %2872 = vmatprep.subr.bf16.mxu0 %v2871_v31 }
 0x33e   :  { %v3011_v54 = vpop.eup %3010 }
 0x33f   :  { %v3013_v56 = vpop.eup %3012 }
 0x340   :  { %2874 = vmatpush3.bf16.msra.mxu0 %v2871_v31  ;;  %v1060_v31 = vld [vmem:[#allocation10 + $0x70] sm:$0xff] }
 0x341   :  { %2892 = vmatprep.subr.bf16.mxu0 %v2891_v39 }
 0x3a2   :  { %v922_v13 = vpop.permute.xlu0 %921 }
 0x3a3   :  { %v933_v49 = vmul.f32 %v3007_v10, %v922_v13 }
 0x3a4   :  { %v924_v48 = vpop.permute.xlu1 %923 }
 0x3a5   :  { %v934_v50 = vmul.f32 %v3009_v47, %v924_v48 }
 0x3a6   :  { %v926_v51 = vpop.permute.xlu0 %925 }
 0x3a7   :  { %v937_v55 = vpack.c.bf16 %v934_v50, %v933_v49  ;;  %v935_v58 = vmul.f32 %v3011_v54, %v926_v51 }
 0x3a8   :  { %v928_v57 = vpop.permute.xlu1 %927 }
 0x3a9   :  { %v936_v27 = vmul.f32 %v3013_v56, %v928_v57  ;;  %2604 = vmatpush3.bf16.msra.mxu1 %v937_v55 }
 0x3aa   :  { %2605 = vmatprep.subr.bf16.mxu1 %v3233_v26 }
 0x3ab   :  { %v938_v62 = vpack.c.bf16 %v936_v27, %v935_v58 }
 0x3ad   :  { %2606 = vmatpush3.bf16.msra.mxu1 %v938_v62 }
 0x3ae   :  { %2876 = vmatprep.subr.bf16.mxu1 %v2875_v6 }
 0x3b0   :  { %2608 = vmatmul.mubr.msk.bf16.vlgmr.msra.gmra.mrb[12].mxu1 %vm939_vm14, %v3626_v63 }
 0x3b1   :  { %2878 = vmatpush3.bf16.msra.mxu1 %v2875_v6  ;;  %v2275_v6 = vld [vmem:[%s3890_s13] ss:$0 sm:$0xff] }
 0x3b2   :  { %2880 = vmatprep.subr.bf16.mxu1 %v2879_v18 }
 0x3b5   :  { %2882 = vmatpush3.bf16.msra.mxu1 %v2879_v18 }
 0x3b6   :  { %2884 = vmatprep.subr.bf16.mxu1 %v2883_v24 }
 0x3b9   :  { %2886 = vmatpush3.bf16.msra.mxu1 %v2883_v24  ;;  %v2895_v24 = vpack.c.bf16 %v1057_v21, %v1056_v20 }
 0x3ba   :  { %2888 = vmatprep.subr.bf16.mxu1 %v2887_v33 }
 0x3bd   :  { %2890 = vmatpush3.bf16.msra.mxu1 %v2887_v33  ;;  %v2903_v33 = vpack.c.bf16 %v1061_v32, %v1060_v31 }
 0x483   :  { %v977_v40 = vpop.f32.mrb[12].mxu1 }
 0x484   :  { %v984_v41 = vadd.f32 %v977_v40, %v3518_v15  ;;  %v2609_v42 = vpop.f32.mrb[13].mxu1 }
 0x485   :  { %v980_v43 = vpop.f32.mrb[14].mxu1 }
 0x486   :  { %v985_v44 = vadd.f32 %v980_v43, %v3522_v17  ;;  %v2610_v7 = vpop.f32.mrb[15].mxu1  ;;  %v986_v4 = vsel %vm444_vm7, %v984_v41, 0.0 }
 0x488   :  { %v987_v13 = vsel %vm444_vm7, %v985_v44, 0.0 }
 0x489   :  { %v988_v45 = vadd.f32 %v987_v13, %v986_v4  ;;  %v2290_v13 = vld [vmem:[%s3889_s12 + $0x1] ss:$0 sm:$0xff] }
 0x48b   :  { %v989_v10 = vrot.slane %v988_v45, 4 }
 0x48d   :  { %v990_v46 = vadd.f32 %v989_v10, %v988_v45 }
 0x48f   :  { %v991_v47 = vrot.slane %v990_v46, 2 }
 0x491   :  { %v992_v48 = vadd.f32 %v991_v47, %v990_v46 }
 0x493   :  { %v993_v49 = vrot.slane %v992_v48, 1 }
 0x495   :  { %v994_v50 = vadd.f32 %v993_v49, %v992_v48 }
 0x497   :  { %v996_v51 = vmul.f32 0.0625, %v994_v50 }
 0x499   :  { %v997_v54 = vsub.f32 %v984_v41, %v996_v51  ;;  %v998_v55 = vsub.f32 %v985_v44, %v996_v51 }
 0x49b   :  { %v999_v15 = vmul.f32 %v997_v54, %v997_v54  ;;  %v1000_v56 = vmul.f32 %v998_v55, %v998_v55 }
 0x49d   :  { %v1001_v57 = vsel %vm444_vm7, %v999_v15, 0.0  ;;  %v1002_v17 = vsel %vm444_vm7, %v1000_v56, 0.0 }
 0x49e   :  { %v1003_v58 = vadd.f32 %v1002_v17, %v1001_v57 }
 0x4a0   :  { %v1004_v27 = vrot.slane %v1003_v58, 4 }
 0x4a2   :  { %v1005_v59 = vadd.f32 %v1004_v27, %v1003_v58 }
 0x4a4   :  { %v1006_v61 = vrot.slane %v1005_v59, 2 }
 0x4a6   :  { %v1007_v62 = vadd.f32 %v1006_v61, %v1005_v59 }
 0x4a8   :  { %v1008_v0 = vrot.slane %v1007_v62, 1 }
 0x4aa   :  { %v1009_v1 = vadd.f32 %v1008_v0, %v1007_v62 }
 0x4ac   :  { %v1010_v2 = vmul.f32 0.0625, %v1009_v1 }
 0x4ae   :  { %v1011_v3 = vadd.f32 1e-05, %v1010_v2 }
 0x4b0   :  { %3014 = vrsqrt.f32 %v1011_v3 }
 0x4ba   :  { %v3015_v5 = vpop.eup %3014 }
 0x4bb   :  { %v1013_v8 = vmul.f32 %v3015_v5, %v997_v54  ;;  %v1014_v9 = vmul.f32 %v3015_v5, %v998_v55 }
 0x4bd   :  { %v1022_v12 = vmul.f32 %v2275_v6, %v1013_v8  ;;  %v1023_v14 = vmul.f32 %v2275_v6, %v1014_v9 }
 0x4bf   :  { %v1032_v18 = vadd.f32 %v2276_v11, %v1023_v14  ;;  %v1031_v19 = vadd.f32 %v2276_v11, %v1022_v12 }
 0x4c1   :  { %v3666_v22 = vmax.f32 %v1032_v18, 0.0  ;;  %v3668_v23 = vmax.f32 %v1031_v19, 0.0 }
 0x4c3   :  { %2627 = vmatprep.mubr.msk.f32.mxu0 %vm444_vm7, %v3668_v23  ;;  %2646 = vmatprep.mubr.msk.f32.mxu1 %vm444_vm7, %v3668_v23 }
 0x4c4   :  { %2628 = vmatmul.mubr.msk.f32.vlgmr.msra.gmra.mrb[8].mxu0 %vm444_vm7, %v3666_v22  ;;  %2647 = vmatmul.mubr.msk.f32.vlgmr.msra.gmra.mrb[10].mxu1 %vm444_vm7, %v3666_v22 }
 0x4c5   :  { %2894 = vmatpush3.bf16.msra.mxu0 %v2891_v39  ;;  %2665 = vmatprep.mubr.msk.f32.mxu0 %vm444_vm7, %v3520_v16 }
 0x4c6   :  { %2673 = vmatprep.mubr.msk.bf16.mxu1 %vm706_vm10, %v3546_v37  ;;  %2896 = vmatprep.subr.bf16.mxu0 %v2895_v24 }
 0x4c9   :  { %2898 = vmatpush3.bf16.msra.mxu0 %v2895_v24 }
 0x4ca   :  { %2900 = vmatprep.subr.bf16.mxu0 %v2899_v30 }
 0x4cd   :  { %2902 = vmatpush3.bf16.msra.mxu0 %v2899_v30 }
 0x4ce   :  { %2904 = vmatprep.subr.bf16.mxu0 %v2903_v33 }
 0x4d1   :  { %2906 = vmatpush3.bf16.msra.mxu0 %v2903_v33 }
 0x4d4   :  { %2666 = vmatmul.mubr.msk.f32.vlgmr.msra.gmra.mrb[10].mxu0 %vm444_vm7, %v3534_v25 }
 0x4d5   :  { %2668 = vmatprep.mubr.msk.f32.mxu0 %vm444_vm7, %v3544_v36 }
 0x4d8   :  { %2669 = vmatmul.mubr.msk.f32.gmra.mrb[12].mxu0 %vm444_vm7, %v3542_v34 }
 0x597   :  { %v2629_v35 = vpop.f32.mrb[8].mxu0  ;;  %v2648_v38 = vpop.f32.mrb[10].mxu1 }
 0x598   :  { %v1136_v39 = vpop.f32.mrb[9].mxu0  ;;  %v1211_v40 = vpop.f32.mrb[11].mxu1 }
 0x599   :  { %v1311_v41 = vpack.c.bf16 %v2629_v35, %v1136_v39  ;;  %v1312_v42 = vpack.c.bf16 %v2648_v38, %v1211_v40 }
 0x59b   :  { %2671 = vmatprep.subr.bf16.mxu1 %v1312_v42 }
 0x59c   :  { %2672 = vmatpush3.bf16.msra.mxu1 %v1312_v42 }
 0x59d   :  { %2677 = vmatprep.subr.bf16.mxu1 %v1311_v41 }
 0x59f   :  { %2674 = vmatmul.mubr.msk.bf16.vlgmr.msra.gmra.mrb[16].mxu1 %vm706_vm10, %v3558_v52 }
 0x5a0   :  { %2678 = vmatpush3.bf16.msra.mxu1 %v1311_v41  ;;  %2679 = vmatprep.mubr.msk.bf16.mxu1 %vm706_vm10, %v3560_v53 }
 0x5a1   :  { %2683 = vmatprep.subr.bf16.mxu1 %v3233_v26 }
 0x5a7   :  { %v2667_v43 = vpop.f32.mrb[10].mxu0 }
 0x5a8   :  { %v1292_v44 = vpop.f32.mrb[11].mxu0  ;;  %v1298_v50 = vadd.f32 %v2667_v43, %v2290_v13 }
 0x5a9   :  { %v1293_v10 = vadd.f32 %v2290_v13, %v1292_v44 }
 0x5ab   :  { %v2670_v7 = vpop.f32.mrb[12].mxu0  ;;  %2680 = vmatmul.mubr.msk.bf16.vlgmr.msra.gmra.mrb[16].mxu1 %vm706_vm10, %v3568_v60 }
 0x5ac   :  { %v1302_v4 = vpop.f32.mrb[13].mxu0  ;;  %2687 = vmatprep.mubr.msk.bf16.mxu1 %vm3234_vm6, %v3233_v26  ;;  %v1308_v47 = vadd.f32 %v2670_v7, %v2290_v13 }
 0x5ad   :  { %v1303_v45 = vadd.f32 %v2290_v13, %v1302_v4 }
 0x67e   :  { %v2681_v46 = vpop.f32.mrb[16].mxu1 }
 0x67f   :  { %v3700_v48 = vadd.f32 %v2681_v46, %v1303_v45  ;;  %v1396_v49 = vpop.f32.mrb[17].mxu1 }
 0x680   :  { %v3702_v51 = vadd.f32 %v1396_v49, %v1293_v10  ;;  %v2682_v54 = vpop.f32.mrb[18].mxu1 }
 0x681   :  { %v1453_v55 = vand.u32 2147483647, %v3700_v48  ;;  %v3705_v15 = vadd.f32 %v2682_v54, %v1308_v47  ;;  %v1399_v56 = vpop.f32.mrb[19].mxu1  ;;  %v1441_v38 = vmax.f32 %v3700_v48, 0.0  ;;  %vm1445_vm5 = vcmp.ne.f32.partialorder %v3700_v48, %v3700_v48 }
 0x682   :  { %v1451_v57 = vand.u32 2147483647, %v3702_v51  ;;  %v3708_v17 = vadd.f32 %v1399_v56, %v1298_v50  ;;  %v1439_v7 = vmax.f32 %v3702_v51, 0.0  ;;  %vm1443_vm3 = vcmp.ne.f32.partialorder %v3702_v51, %v3702_v51 }
 0x683   :  { %v1457_v58 = vsub.f32 0.0, %v1453_v55  ;;  %v1454_v27 = vand.u32 2147483647, %v3705_v15  ;;  %vm1446_vm8 = vcmp.ne.f32.partialorder %v3705_v15, %v3705_v15 }
 0x684   :  { %v1455_v59 = vsub.f32 0.0, %v1451_v57  ;;  %v1452_v61 = vand.u32 2147483647, %v3708_v17  ;;  %v1440_v57 = vmax.f32 %v3708_v17, 0.0  ;;  %vm1444_vm4 = vcmp.ne.f32.partialorder %v3708_v17, %v3708_v17 }
 0x685   :  { %v1463_v62 = vmul.f32 1.442695, %v1457_v58  ;;  %v1458_v0 = vsub.f32 0.0, %v1454_v27 }
 0x686   :  { %v1459_v1 = vmul.f32 1.442695, %v1455_v59  ;;  %v1456_v2 = vsub.f32 0.0, %v1452_v61 }
 0x687   :  { %3016 = vpow2.f32 %v1463_v62  ;;  %v1465_v3 = vmul.f32 1.442695, %v1458_v0  ;;  %v1442_v0 = vmax.f32 %v3705_v15, 0.0 }
 0x688   :  { %3018 = vpow2.f32 %v1459_v1  ;;  %v1461_v5 = vmul.f32 1.442695, %v1456_v2 }
 0x689   :  { %3020 = vpow2.f32 %v1465_v3 }
 0x68a   :  { %3022 = vpow2.f32 %v1461_v5 }
 0x691   :  { %v3017_v6 = vpop.eup %3016 }
 0x692   :  { %v3019_v8 = vpop.eup %3018  ;;  %v1485_v9 = vadd.f32 1.0, %v3017_v6  ;;  %v1488_v21 = vmul.f32 -0.5, %v3017_v6  ;;  %v1491_v33 = vand.u32 2147483647, %v3017_v6 }
 0x693   :  { %v3021_v11 = vpop.eup %3020  ;;  %v1467_v12 = vadd.f32 1.0, %v3019_v8  ;;  %v1470_v20 = vmul.f32 -0.5, %v3019_v8  ;;  %v1473_v31 = vand.u32 2147483647, %v3019_v8 }
 0x694   :  { %v3023_v14 = vpop.eup %3022  ;;  %3024 = vlog2.f32 %v1485_v9  ;;  %v1494_v18 = vadd.f32 1.0, %v3021_v11  ;;  %v1497_v28 = vmul.f32 -0.5, %v3021_v11  ;;  %v1489_v30 = vadd.f32 1.0, %v1488_v21 }
 0x695   :  { %3026 = vlog2.f32 %v1467_v12  ;;  %v1476_v19 = vadd.f32 1.0, %v3023_v14  ;;  %v1479_v24 = vmul.f32 -0.5, %v3023_v14  ;;  %v1471_v29 = vadd.f32 1.0, %v1470_v20 }
 0x696   :  { %3028 = vlog2.f32 %v1494_v18  ;;  %v1498_v39 = vadd.f32 1.0, %v1497_v28  ;;  %v1482_v41 = vand.u32 2147483647, %v3023_v14  ;;  %v1500_v43 = vand.u32 2147483647, %v3021_v11 }
 0x697   :  { %3030 = vlog2.f32 %v1476_v19  ;;  %v1480_v32 = vadd.f32 1.0, %v1479_v24  ;;  %v1472_v13 = vmul.f32 %v3019_v8, %v1471_v29  ;;  %v1490_v45 = vmul.f32 %v3017_v6, %v1489_v30 }
 0x698   :  { %vm1474_vm15 = vcmp.lt.f32.partialorder %v1473_v31, 0.0004427343  ;;  %vm1492_vm0 = vcmp.lt.f32.partialorder %v1491_v33, 0.0004427343  ;;  %v1499_v55 = vmul.f32 %v3021_v11, %v1498_v39  ;;  %vm1483_vm1 = vcmp.lt.f32.partialorder %v1482_v41, 0.0004427343 }
 0x699   :  { %v1481_v46 = vmul.f32 %v3023_v14, %v1480_v32  ;;  %vm1501_vm2 = vcmp.lt.f32.partialorder %v1500_v43, 0.0004427343  ;;  %v2299_v6 = vmul.f32 -1.442695, %v3702_v51  ;;  %v2300_v8 = vmul.f32 -1.442695, %v3708_v17 }
 0x69a   :  { %v2301_v9 = vmul.f32 -1.442695, %v3700_v48  ;;  %v2302_v11 = vmul.f32 -1.442695, %v3705_v15  ;;  %v2309_v43 = vld [vmem:[%s3886_s9 + $0x88] sm:$0xff] }
 0x69b   :  { %3032 = vpow2.f32 %v2299_v6 }
 0x69c   :  { %3034 = vpow2.f32 %v2300_v8 }
 0x69d   :  { %3036 = vpow2.f32 %v2301_v9 }
 0x69e   :  { %v3025_v35 = vpop.eup %3024  ;;  %3038 = vpow2.f32 %v2302_v11 }
 0x69f   :  { %v3027_v40 = vpop.eup %3026  ;;  %v1487_v42 = vmul.f32 0.6931472, %v3025_v35 }
 0x6a0   :  { %v3029_v44 = vpop.eup %3028  ;;  %v1469_v4 = vmul.f32 0.6931472, %v3027_v40 }
 0x6a1   :  { %v3031_v10 = vpop.eup %3030  ;;  %v1496_v47 = vmul.f32 0.6931472, %v3029_v44  ;;  %v1493_v54 = vsel %vm1492_vm0, %v1490_v45, %v1487_v42  ;;  %v2308_v42 = vld [vmem:[%s3886_s9 + $0x80] sm:$0xff]  ;;  %v2310_v45 = vld [vmem:[%s3886_s9 + $0x90] sm:$0xff] }
 0x6a2   :  { %v1475_v49 = vsel %vm1474_vm15, %v1472_v13, %v1469_v4  ;;  %v1478_v50 = vmul.f32 0.6931472, %v3031_v10  ;;  %v1505_v62 = vadd.f32 %v1493_v54, %v1441_v38  ;;  %v2907_v44 = vpack.c.bf16 %v2309_v43, %v2308_v42  ;;  %v1637_v4 = vld [vmem:[#allocation8 + $0x88] sm:$0xff]  ;;  %v2311_v10 = vld [vmem:[%s3886_s9 + $0x98] sm:$0xff]  ;;  %v2312_v54 = vld [vmem:[%s3886_s9 + $0xa0] sm:$0xff] }
 0x6a3   :  { %v1503_v56 = vadd.f32 %v1475_v49, %v1439_v7  ;;  %v1502_v27 = vsel %vm1501_vm2, %v1499_v55, %v1496_v47  ;;  %v1636_v7 = vld [vmem:[#allocation8 + $0x80] sm:$0xff]  ;;  %v1638_v47 = vld [vmem:[#allocation8 + $0x90] sm:$0xff]  ;;  %v1639_v49 = vld [vmem:[#allocation8 + $0x98] sm:$0xff] }
 0x6a4   :  { %v1484_v58 = vsel %vm1483_vm1, %v1481_v46, %v1478_v50  ;;  %v1506_v2 = vadd.f32 %v1502_v27, %v1442_v0  ;;  %v1509_v3 = vsel %vm1445_vm5, %v3700_v48, %v1505_v62  ;;  %v2923_v13 = vpack.c.bf16 %v1637_v4, %v1636_v7  ;;  %2908 = vmatprep.subr.bf16.mxu0 %v2907_v44  ;;  %v2313_v55 = vld [vmem:[%s3886_s9 + $0xa8] sm:$0xff]  ;;  %v1642_v62 = vld [vmem:[#allocation8 + $0xb0] sm:$0xff] }
 0x6a5   :  { %v1507_v59 = vsel %vm1443_vm3, %v3702_v51, %v1503_v56  ;;  %v1504_v61 = vadd.f32 %v1484_v58, %v1440_v57  ;;  %v3033_v12 = vpop.eup %3032  ;;  %2910 = vmatpush3.bf16.msra.mxu0 %v2907_v44  ;;  %v2911_v46 = vpack.c.bf16 %v2311_v10, %v2310_v45  ;;  %v2927_v50 = vpack.c.bf16 %v1639_v49, %v1638_v47  ;;  %v1640_v57 = vld [vmem:[#allocation8 + $0xa0] sm:$0xff]  ;;  %v1641_v58 = vld [vmem:[#allocation8 + $0xa8] sm:$0xff] }
 0x6a6   :  { %1515 = vrot.lane.b32.xlu0 %v1507_v59, %s3235_s21  ;;  %v1510_v5 = vsel %vm1446_vm8, %v3705_v15, %v1506_v2  ;;  %v3035_v14 = vpop.eup %3034  ;;  %v1427_v18 = vadd.f32 1.0, %v3033_v12  ;;  %v2915_v56 = vpack.c.bf16 %v2313_v55, %v2312_v54  ;;  %v2931_v27 = vpack.c.bf16 %v1641_v58, %v1640_v57  ;;  %v2314_v59 = vld [vmem:[%s3886_s9 + $0xb0] sm:$0xff] }
 0x6a7   :  { %v1508_v1 = vsel %vm1444_vm4, %v3708_v17, %v1504_v61  ;;  %v3037_v19 = vpop.eup %3036  ;;  %v1428_v20 = vadd.f32 1.0, %v3035_v14  ;;  %2912 = vmatprep.subr.bf16.mxu0 %v2911_v46  ;;  %v2315_v61 = vld [vmem:[%s3886_s9 + $0xb8] sm:$0xff] }
 0x6a8   :  { %1517 = vrot.lane.b32.xlu1 %v1508_v1, %s3235_s21  ;;  %v3039_v21 = vpop.eup %3038  ;;  %3040 = vrcp.f32 %v1427_v18  ;;  %v1429_v24 = vadd.f32 1.0, %v3037_v19  ;;  %v2919_v0 = vpack.c.bf16 %v2315_v61, %v2314_v59  ;;  %v1643_v1 = vld [vmem:[#allocation8 + $0xb8] sm:$0xff]  ;;  %v1647_v55 = vld [vmem:[#allocation10 + $0x90] sm:$0xff]  ;;  %v1649_v59 = vld [vmem:[#allocation10 + $0xa0] sm:$0xff] }
 0x6a9   :  { %3042 = vrcp.f32 %v1428_v20  ;;  %v1430_v51 = vadd.f32 1.0, %v3039_v21  ;;  %2914 = vmatpush3.bf16.msra.mxu0 %v2911_v46  ;;  %v2935_v2 = vpack.c.bf16 %v1643_v1, %v1642_v62  ;;  %v2307_v46 = vld [vmem:[%s3891_s14 + $0x1] ss:$0 sm:$0xff]  ;;  %v1650_v61 = vld [vmem:[#allocation10 + $0xa8] sm:$0xff] }
 0x6aa   :  { %1519 = vrot.lane.b32.xlu0 %v1509_v3, %s3235_s21  ;;  %3044 = vrcp.f32 %v1429_v24  ;;  %2916 = vmatprep.subr.bf16.mxu0 %v2915_v56  ;;  %v1645_v3 = vld [vmem:[#allocation10 + $0x80] sm:$0xff]  ;;  %v2947_v62 = vpack.c.bf16 %v1650_v61, %v1649_v59  ;;  %v1652_v1 = vld [vmem:[#allocation10 + $0xb8] sm:$0xff] }
 0x6ab   :  { %3046 = vrcp.f32 %v1430_v51 }
 0x6ac   :  { %1521 = vrot.lane.b32.xlu1 %v1510_v5, %s3235_s21  ;;  %v1646_v5 = vld [vmem:[#allocation10 + $0x88] sm:$0xff] }
 0x6ad   :  { %2918 = vmatpush3.bf16.msra.mxu0 %v2915_v56  ;;  %v2939_v6 = vpack.c.bf16 %v1646_v5, %v1645_v3  ;;  %v1648_v56 = vld [vmem:[#allocation10 + $0x98] sm:$0xff] }
 0x6ae   :  { %2920 = vmatprep.subr.bf16.mxu0 %v2919_v0 }
 0x6b1   :  { %2922 = vmatpush3.bf16.msra.mxu0 %v2919_v0  ;;  %v1651_v0 = vld [vmem:[#allocation10 + $0xb0] sm:$0xff] }
 0x6b2   :  { %v3041_v48 = vpop.eup %3040  ;;  %2940 = vmatprep.subr.bf16.mxu0 %v2939_v6 }
 0x6b3   :  { %v3043_v28 = vpop.eup %3042 }
 0x6b4   :  { %v3045_v32 = vpop.eup %3044 }
 0x6b5   :  { %v3047_v35 = vpop.eup %3046 }
 0x718   :  { %v1516_v17 = vpop.permute.xlu0 %1515 }
 0x719   :  { %v1527_v15 = vmul.f32 %v3041_v48, %v1516_v17 }
 0x71a   :  { %v1518_v29 = vpop.permute.xlu1 %1517 }
 0x71b   :  { %v1528_v30 = vmul.f32 %v3043_v28, %v1518_v29 }
 0x71c   :  { %v1520_v31 = vpop.permute.xlu0 %1519 }
 0x71d   :  { %v1531_v33 = vpack.c.bf16 %v1528_v30, %v1527_v15  ;;  %v1529_v39 = vmul.f32 %v3045_v32, %v1520_v31 }
 0x71e   :  { %v1522_v38 = vpop.permute.xlu1 %1521 }
 0x71f   :  { %v1530_v40 = vmul.f32 %v3047_v35, %v1522_v38  ;;  %2684 = vmatpush3.bf16.msra.mxu1 %v1531_v33 }
 0x720   :  { %2685 = vmatprep.subr.bf16.mxu1 %v3233_v26 }
 0x721   :  { %v1532_v41 = vpack.c.bf16 %v1530_v40, %v1529_v39 }
 0x723   :  { %2686 = vmatpush3.bf16.msra.mxu1 %v1532_v41 }
 0x724   :  { %2924 = vmatprep.subr.bf16.mxu1 %v2923_v13 }
 0x726   :  { %2688 = vmatmul.mubr.msk.bf16.vlgmr.msra.gmra.mrb[20].mxu1 %vm939_vm14, %v3626_v63 }
 0x727   :  { %2926 = vmatpush3.bf16.msra.mxu1 %v2923_v13  ;;  %v2305_v13 = vld [vmem:[%s3890_s13 + $0x1] ss:$0 sm:$0xff] }
 0x728   :  { %2928 = vmatprep.subr.bf16.mxu1 %v2927_v50 }
 0x72b   :  { %2930 = vmatpush3.bf16.msra.mxu1 %v2927_v50 }
 0x72c   :  { %2932 = vmatprep.subr.bf16.mxu1 %v2931_v27 }
 0x72f   :  { %2934 = vmatpush3.bf16.msra.mxu1 %v2931_v27  ;;  %v2943_v27 = vpack.c.bf16 %v1648_v56, %v1647_v55 }
 0x730   :  { %2936 = vmatprep.subr.bf16.mxu1 %v2935_v2 }
 0x733   :  { %2938 = vmatpush3.bf16.msra.mxu1 %v2935_v2  ;;  %v2951_v2 = vpack.c.bf16 %v1652_v1, %v1651_v0 }
 0x7f9   :  { %v1567_v8 = vpop.f32.mrb[20].mxu1 }
 0x7fa   :  { %v1574_v9 = vadd.f32 %v1567_v8, %v3668_v23  ;;  %v2689_v11 = vpop.f32.mrb[21].mxu1 }
 0x7fb   :  { %v1570_v12 = vpop.f32.mrb[22].mxu1  ;;  %v2321_v11 = vld [vmem:[%s3889_s12 + $0x2] ss:$0 sm:$0xff] }
 0x7fc   :  { %v1575_v14 = vadd.f32 %v1570_v12, %v3666_v22  ;;  %v2690_v18 = vpop.f32.mrb[23].mxu1  ;;  %v1576_v19 = vsel %vm444_vm7, %v1574_v9, 0.0 }
 0x7fe   :  { %v1577_v20 = vsel %vm444_vm7, %v1575_v14, 0.0 }
 0x7ff   :  { %v1578_v21 = vadd.f32 %v1577_v20, %v1576_v19 }
 0x801   :  { %v1579_v24 = vrot.slane %v1578_v21, 4 }
 0x803   :  { %v1580_v51 = vadd.f32 %v1579_v24, %v1578_v21 }
 0x805   :  { %v1581_v17 = vrot.slane %v1580_v51, 2 }
 0x807   :  { %v1582_v48 = vadd.f32 %v1581_v17, %v1580_v51 }
 0x809   :  { %v1583_v28 = vrot.slane %v1582_v48, 1 }
 0x80b   :  { %v1584_v29 = vadd.f32 %v1583_v28, %v1582_v48 }
 0x80d   :  { %v1585_v15 = vmul.f32 0.0625, %v1584_v29 }
 0x80f   :  { %v1586_v30 = vsub.f32 %v1574_v9, %v1585_v15  ;;  %v1587_v31 = vsub.f32 %v1575_v14, %v1585_v15 }
 0x811   :  { %v1588_v23 = vmul.f32 %v1586_v30, %v1586_v30  ;;  %v1589_v32 = vmul.f32 %v1587_v31, %v1587_v31 }
 0x813   :  { %v1590_v33 = vsel %vm444_vm7, %v1588_v23, 0.0  ;;  %v1591_v22 = vsel %vm444_vm7, %v1589_v32, 0.0 }
 0x814   :  { %v1592_v35 = vadd.f32 %v1591_v22, %v1590_v33 }
 0x816   :  { %v1593_v38 = vrot.slane %v1592_v35, 4 }
 0x818   :  { %v1594_v39 = vadd.f32 %v1593_v38, %v1592_v35 }
 0x81a   :  { %v1595_v40 = vrot.slane %v1594_v39, 2 }
 0x81c   :  { %v1596_v41 = vadd.f32 %v1595_v40, %v1594_v39 }
 0x81e   :  { %v1597_v42 = vrot.slane %v1596_v41, 1 }
 0x820   :  { %v1598_v43 = vadd.f32 %v1597_v42, %v1596_v41 }
 0x822   :  { %v1599_v44 = vmul.f32 0.0625, %v1598_v43 }
 0x824   :  { %v1600_v7 = vadd.f32 1e-05, %v1599_v44 }
 0x826   :  { %3048 = vrsqrt.f32 %v1600_v7 }
 0x830   :  { %v3049_v4 = vpop.eup %3048 }
 0x831   :  { %v1602_v45 = vmul.f32 %v3049_v4, %v1586_v30  ;;  %v1603_v10 = vmul.f32 %v3049_v4, %v1587_v31 }
 0x833   :  { %v1612_v47 = vmul.f32 %v2305_v13, %v1602_v45  ;;  %v1613_v49 = vmul.f32 %v2305_v13, %v1603_v10 }
 0x835   :  { %v1623_v50 = vadd.f32 %v2307_v46, %v1613_v49  ;;  %v1622_v54 = vadd.f32 %v2307_v46, %v1612_v47 }
 0x837   :  { %v3775_v57 = vmax.f32 %v1623_v50, 0.0  ;;  %v3777_v58 = vmax.f32 %v1622_v54, 0.0 }
 0x839   :  { %2707 = vmatprep.mubr.msk.f32.mxu0 %vm444_vm7, %v3777_v58  ;;  %2726 = vmatprep.mubr.msk.f32.mxu1 %vm444_vm7, %v3777_v58 }
 0x83a   :  { %2708 = vmatmul.mubr.msk.f32.vlgmr.msra.gmra.mrb[14].mxu0 %vm444_vm7, %v3775_v57  ;;  %2727 = vmatmul.mubr.msk.f32.vlgmr.msra.gmra.mrb[24].mxu1 %vm444_vm7, %v3775_v57 }
 0x83b   :  { %2942 = vmatpush3.bf16.msra.mxu0 %v2939_v6  ;;  %2745 = vmatprep.mubr.msk.f32.mxu0 %vm444_vm7, %v3520_v16 }
 0x83c   :  { %2753 = vmatprep.mubr.msk.bf16.mxu1 %vm706_vm10, %v3546_v37  ;;  %2944 = vmatprep.subr.bf16.mxu0 %v2943_v27 }
 0x83f   :  { %2946 = vmatpush3.bf16.msra.mxu0 %v2943_v27 }
 0x840   :  { %2948 = vmatprep.subr.bf16.mxu0 %v2947_v62 }
 0x843   :  { %2950 = vmatpush3.bf16.msra.mxu0 %v2947_v62 }
 0x844   :  { %2952 = vmatprep.subr.bf16.mxu0 %v2951_v2 }
 0x847   :  { %2954 = vmatpush3.bf16.msra.mxu0 %v2951_v2 }
 0x848   :  { %2763 = vmatprep.subr.bf16.mxu0 %v3233_v26 }
 0x84a   :  { %2746 = vmatmul.mubr.msk.f32.vlgmr.msra.gmra.mrb[16].mxu0 %vm444_vm7, %v3534_v25 }
 0x84b   :  { %2748 = vmatprep.mubr.msk.f32.mxu0 %vm444_vm7, %v3544_v36 }
 0x84e   :  { %2749 = vmatmul.mubr.msk.f32.gmra.mrb[18].mxu0 %vm444_vm7, %v3542_v34 }
 0x84f   :  { %2767 = vmatprep.mubr.msk.bf16.mxu0 %vm3234_vm6, %v3233_v26 }
 0x90d   :  { %v2709_v16 = vpop.f32.mrb[14].mxu0  ;;  %v2728_v37 = vpop.f32.mrb[24].mxu1 }
 0x90e   :  { %v1727_v3 = vpop.f32.mrb[15].mxu0  ;;  %v1802_v5 = vpop.f32.mrb[25].mxu1 }
 0x90f   :  { %v1902_v6 = vpack.c.bf16 %v2709_v16, %v1727_v3  ;;  %v1903_v8 = vpack.c.bf16 %v2728_v37, %v1802_v5 }
 0x911   :  { %2751 = vmatprep.subr.bf16.mxu1 %v1903_v8 }
 0x912   :  { %2752 = vmatpush3.bf16.msra.mxu1 %v1903_v8 }
 0x913   :  { %2757 = vmatprep.subr.bf16.mxu1 %v1902_v6 }
 0x915   :  { %2754 = vmatmul.mubr.msk.bf16.vlgmr.msra.gmra.mrb[28].mxu1 %vm706_vm10, %v3558_v52 }
 0x916   :  { %2758 = vmatpush3.bf16.msra.mxu1 %v1902_v6  ;;  %2759 = vmatprep.mubr.msk.bf16.mxu1 %vm706_vm10, %v3560_v53 }
 0x91d   :  { %v2747_v25 = vpop.f32.mrb[16].mxu0 }
 0x91e   :  { %v1883_v34 = vpop.f32.mrb[17].mxu0  ;;  %v1889_v21 = vadd.f32 %v2747_v25, %v2321_v11 }
 0x91f   :  { %v1884_v14 = vadd.f32 %v2321_v11, %v1883_v34 }
 0x921   :  { %v2750_v36 = vpop.f32.mrb[18].mxu0  ;;  %2760 = vmatmul.mubr.msk.bf16.vlgmr.msra.gmra.mrb[28].mxu1 %vm706_vm10, %v3568_v60 }
 0x922   :  { %v1893_v9 = vpop.f32.mrb[19].mxu0  ;;  %v1899_v19 = vadd.f32 %v2750_v36, %v2321_v11 }
 0x923   :  { %v1894_v12 = vadd.f32 %v2321_v11, %v1893_v9 }
 0x9f4   :  { %v2761_v18 = vpop.f32.mrb[28].mxu1 }
 0x9f5   :  { %v3809_v52 = vadd.f32 %v2761_v18, %v1894_v12  ;;  %v1987_v20 = vpop.f32.mrb[29].mxu1 }
 0x9f6   :  { %v3811_v53 = vadd.f32 %v1987_v20, %v1884_v14  ;;  %v2762_v24 = vpop.f32.mrb[30].mxu1 }
 0x9f7   :  { %v2044_v51 = vand.u32 2147483647, %v3809_v52  ;;  %v3814_v17 = vadd.f32 %v2762_v24, %v1899_v19  ;;  %v1990_v60 = vpop.f32.mrb[31].mxu1  ;;  %v2032_v27 = vmax.f32 %v3809_v52, 0.0  ;;  %vm2036_vm15 = vcmp.ne.f32.partialorder %v3809_v52, %v3809_v52 }
 0x9f8   :  { %v2042_v48 = vand.u32 2147483647, %v3811_v53  ;;  %v3817_v28 = vadd.f32 %v1990_v60, %v1889_v21  ;;  %v2030_v16 = vmax.f32 %v3811_v53, 0.0  ;;  %vm2034_vm12 = vcmp.ne.f32.partialorder %v3811_v53, %v3811_v53 }
 0x9f9   :  { %v2048_v29 = vsub.f32 0.0, %v2044_v51  ;;  %v2045_v15 = vand.u32 2147483647, %v3814_v17  ;;  %v2033_v51 = vmax.f32 %v3814_v17, 0.0  ;;  %vm2037_vm0 = vcmp.ne.f32.partialorder %v3814_v17, %v3814_v17 }
 0x9fa   :  { %v2046_v30 = vsub.f32 0.0, %v2042_v48  ;;  %v2043_v31 = vand.u32 2147483647, %v3817_v28  ;;  %v2031_v14 = vmax.f32 %v3817_v28, 0.0  ;;  %vm2035_vm13 = vcmp.ne.f32.partialorder %v3817_v28, %v3817_v28 }
 0x9fb   :  { %v2054_v23 = vmul.f32 1.442695, %v2048_v29  ;;  %v2049_v32 = vsub.f32 0.0, %v2045_v15 }
 0x9fc   :  { %v2050_v33 = vmul.f32 1.442695, %v2046_v30  ;;  %v2047_v22 = vsub.f32 0.0, %v2043_v31  ;;  %v2330_v30 = vmul.f32 -1.442695, %v3811_v53 }
 0x9fd   :  { %3050 = vpow2.f32 %v2054_v23  ;;  %v2056_v35 = vmul.f32 1.442695, %v2049_v32  ;;  %v2331_v31 = vmul.f32 -1.442695, %v3817_v28  ;;  %v2332_v23 = vmul.f32 -1.442695, %v3809_v52 }
 0x9fe   :  { %3052 = vpow2.f32 %v2050_v33  ;;  %v2052_v38 = vmul.f32 1.442695, %v2047_v22  ;;  %v2333_v32 = vmul.f32 -1.442695, %v3814_v17 }
 0x9ff   :  { %3054 = vpow2.f32 %v2056_v35 }
 0xa00   :  { %3056 = vpow2.f32 %v2052_v38 }
 0xa07   :  { %v3051_v39 = vpop.eup %3050 }
 0xa08   :  { %v3053_v40 = vpop.eup %3052  ;;  %v2076_v41 = vadd.f32 1.0, %v3051_v39  ;;  %v2079_v45 = vmul.f32 -0.5, %v3051_v39  ;;  %v2082_v55 = vand.u32 2147483647, %v3051_v39 }
 0xa09   :  { %v3055_v42 = vpop.eup %3054  ;;  %v2058_v43 = vadd.f32 1.0, %v3053_v40  ;;  %v2061_v13 = vmul.f32 -0.5, %v3053_v40  ;;  %v2064_v50 = vand.u32 2147483647, %v3053_v40 }
 0xa0a   :  { %v3057_v44 = vpop.eup %3056  ;;  %3058 = vlog2.f32 %v2076_v41  ;;  %v2085_v7 = vadd.f32 1.0, %v3055_v42  ;;  %v2088_v46 = vmul.f32 -0.5, %v3055_v42  ;;  %v2080_v49 = vadd.f32 1.0, %v2079_v45 }
 0xa0b   :  { %3060 = vlog2.f32 %v2058_v43  ;;  %v2067_v4 = vadd.f32 1.0, %v3057_v44  ;;  %v2070_v10 = vmul.f32 -0.5, %v3057_v44  ;;  %v2062_v47 = vadd.f32 1.0, %v2061_v13 }
 0xa0c   :  { %3062 = vlog2.f32 %v2085_v7  ;;  %v2089_v59 = vadd.f32 1.0, %v2088_v46  ;;  %v2073_v62 = vand.u32 2147483647, %v3057_v44  ;;  %v2091_v1 = vand.u32 2147483647, %v3055_v42 }
 0xa0d   :  { %3064 = vlog2.f32 %v2067_v4  ;;  %v2071_v54 = vadd.f32 1.0, %v2070_v10  ;;  %v2063_v3 = vmul.f32 %v3053_v40, %v2062_v47  ;;  %v2081_v5 = vmul.f32 %v3051_v39, %v2080_v49 }
 0xa0e   :  { %vm2065_vm10 = vcmp.lt.f32.partialorder %v2064_v50, 0.0004427343  ;;  %vm2083_vm6 = vcmp.lt.f32.partialorder %v2082_v55, 0.0004427343  ;;  %v2090_v11 = vmul.f32 %v3055_v42, %v2089_v59  ;;  %vm2074_vm9 = vcmp.lt.f32.partialorder %v2073_v62, 0.0004427343 }
 0xa0f   :  { %v2072_v8 = vmul.f32 %v3057_v44, %v2071_v54  ;;  %vm2092_vm11 = vcmp.lt.f32.partialorder %v2091_v1, 0.0004427343  ;;  %3066 = vpow2.f32 %v2330_v30 }
 0xa10   :  { %3068 = vpow2.f32 %v2331_v31 }
 0xa11   :  { %3070 = vpow2.f32 %v2332_v23 }
 0xa12   :  { %3072 = vpow2.f32 %v2333_v32 }
 0xa14   :  { %v3059_v56 = vpop.eup %3058 }
 0xa15   :  { %v3061_v61 = vpop.eup %3060  ;;  %v2078_v0 = vmul.f32 0.6931472, %v3059_v56 }
 0xa16   :  { %v3063_v2 = vpop.eup %3062  ;;  %v2060_v37 = vmul.f32 0.6931472, %v3061_v61 }
 0xa17   :  { %v3065_v6 = vpop.eup %3064  ;;  %v2087_v25 = vmul.f32 0.6931472, %v3063_v2  ;;  %v2084_v9 = vsel %vm2083_vm6, %v2081_v5, %v2078_v0 }
 0xa18   :  { %v2066_v34 = vsel %vm2065_vm10, %v2063_v3, %v2060_v37  ;;  %v2069_v36 = vmul.f32 0.6931472, %v3065_v6  ;;  %v2096_v24 = vadd.f32 %v2084_v9, %v2032_v27 }
 0xa19   :  { %v2094_v12 = vadd.f32 %v2066_v34, %v2030_v16  ;;  %v2093_v19 = vsel %vm2092_vm11, %v2090_v11, %v2087_v25  ;;  %v3067_v33 = vpop.eup %3066 }
 0xa1a   :  { %v2075_v18 = vsel %vm2074_vm9, %v2072_v8, %v2069_v36  ;;  %v2097_v48 = vadd.f32 %v2093_v19, %v2033_v51  ;;  %v2100_v29 = vsel %vm2036_vm15, %v3809_v52, %v2096_v24  ;;  %v3069_v22 = vpop.eup %3068  ;;  %v2018_v35 = vadd.f32 1.0, %v3067_v33  ;;  %v2336_v24 = vld [vmem:[%s3890_s13 + $0x2] ss:$0 sm:$0xff] }
 0xa1b   :  { %v2098_v20 = vsel %vm2034_vm12, %v3811_v53, %v2094_v12  ;;  %v2095_v21 = vadd.f32 %v2075_v18, %v2031_v14  ;;  %v3071_v38 = vpop.eup %3070  ;;  %v2019_v39 = vadd.f32 1.0, %v3069_v22 }
 0xa1c   :  { %2106 = vrot.lane.b32.xlu0 %v2098_v20, %s3235_s21  ;;  %v2101_v15 = vsel %vm2037_vm0, %v3814_v17, %v2097_v48  ;;  %v3073_v40 = vpop.eup %3072  ;;  %3074 = vrcp.f32 %v2018_v35  ;;  %v2020_v41 = vadd.f32 1.0, %v3071_v38  ;;  %v2338_v48 = vld [vmem:[%s3891_s14 + $0x2] ss:$0 sm:$0xff] }
 0xa1d   :  { %v2099_v60 = vsel %vm2035_vm13, %v3817_v28, %v2095_v21  ;;  %3076 = vrcp.f32 %v2019_v39  ;;  %v2021_v53 = vadd.f32 1.0, %v3073_v40 }
 0xa1e   :  { %2108 = vrot.lane.b32.xlu1 %v2099_v60, %s3235_s21  ;;  %3078 = vrcp.f32 %v2020_v41 }
 0xa1f   :  { %3080 = vrcp.f32 %v2021_v53 }
 0xa20   :  { %2110 = vrot.lane.b32.xlu0 %v2100_v29, %s3235_s21 }
 0xa22   :  { %2112 = vrot.lane.b32.xlu1 %v2101_v15, %s3235_s21 }
 0xa26   :  { %v3075_v52 = vpop.eup %3074 }
 0xa27   :  { %v3077_v42 = vpop.eup %3076 }
 0xa28   :  { %v3079_v4 = vpop.eup %3078 }
 0xa29   :  { %v3081_v45 = vpop.eup %3080 }
 0xa8e   :  { %v2107_v28 = vpop.permute.xlu0 %2106 }
 0xa8f   :  { %v2118_v17 = vmul.f32 %v3075_v52, %v2107_v28 }
 0xa90   :  { %v2109_v43 = vpop.permute.xlu1 %2108 }
 0xa91   :  { %v2119_v44 = vmul.f32 %v3077_v42, %v2109_v43 }
 0xa92   :  { %v2111_v7 = vpop.permute.xlu0 %2110 }
 0xa93   :  { %v2122_v13 = vpack.c.bf16 %v2119_v44, %v2118_v17  ;;  %v2120_v46 = vmul.f32 %v3079_v4, %v2111_v7 }
 0xa94   :  { %v2113_v10 = vpop.permute.xlu1 %2112 }
 0xa95   :  { %v2121_v47 = vmul.f32 %v3081_v45, %v2113_v10  ;;  %2764 = vmatpush3.bf16.msra.mxu0 %v2122_v13 }
 0xa96   :  { %2765 = vmatprep.subr.bf16.mxu0 %v3233_v26 }
 0xa97   :  { %v2123_v49 = vpack.c.bf16 %v2121_v47, %v2120_v46 }
 0xa99   :  { %2766 = vmatpush3.bf16.msra.mxu0 %v2123_v49 }
 0xa9c   :  { %2768 = vmatmul.mubr.msk.bf16.vlgmr.msra.gmra.mrb[20].mxu0 %vm939_vm14, %v3626_v63 }
 0xb6f   :  { %v2158_v50 = vpop.f32.mrb[20].mxu0 }
 0xb70   :  { %v2165_v54 = vadd.f32 %v2158_v50, %v3777_v58  ;;  %v2769_v55 = vpop.f32.mrb[21].mxu0 }
 0xb71   :  { %v2161_v56 = vpop.f32.mrb[22].mxu0 }
 0xb72   :  { %v2166_v27 = vadd.f32 %v2161_v56, %v3775_v57  ;;  %v2770_v59 = vpop.f32.mrb[23].mxu0  ;;  %v2167_v61 = vsel %vm444_vm7, %v2165_v54, 0.0 }
 0xb74   :  { %v2168_v62 = vsel %vm444_vm7, %v2166_v27, 0.0 }
 0xb75   :  { %v2169_v0 = vadd.f32 %v2168_v62, %v2167_v61 }
 0xb77   :  { %v2170_v1 = vrot.slane %v2169_v0, 4 }
 0xb79   :  { %v2171_v26 = vadd.f32 %v2170_v1, %v2169_v0 }
 0xb7b   :  { %v2172_v2 = vrot.slane %v2171_v26, 2 }
 0xb7d   :  { %v2173_v16 = vadd.f32 %v2172_v2, %v2171_v26 }
 0xb7f   :  { %v2174_v37 = vrot.slane %v2173_v16, 1 }
 0xb81   :  { %v2175_v3 = vadd.f32 %v2174_v37, %v2173_v16 }
 0xb83   :  { %v2176_v63 = vmul.f32 0.0625, %v2175_v3 }
 0xb85   :  { %v2177_v5 = vsub.f32 %v2165_v54, %v2176_v63  ;;  %v2178_v6 = vsub.f32 %v2166_v27, %v2176_v63 }
 0xb87   :  { %v2179_v58 = vmul.f32 %v2177_v5, %v2177_v5  ;;  %v2180_v8 = vmul.f32 %v2178_v6, %v2178_v6 }
 0xb89   :  { %v2181_v25 = vsel %vm444_vm7, %v2179_v58, 0.0  ;;  %v2182_v57 = vsel %vm444_vm7, %v2180_v8, 0.0 }
 0xb8a   :  { %v2183_v34 = vadd.f32 %v2182_v57, %v2181_v25 }
 0xb8c   :  { %v2184_v36 = vrot.slane %v2183_v34, 4 }
 0xb8e   :  { %v2185_v9 = vadd.f32 %v2184_v36, %v2183_v34 }
 0xb90   :  { %v2186_v11 = vrot.slane %v2185_v9, 2 }
 0xb92   :  { %v2187_v12 = vadd.f32 %v2186_v11, %v2185_v9 }
 0xb94   :  { %v2188_v14 = vrot.slane %v2187_v12, 1 }
 0xb96   :  { %v2189_v18 = vadd.f32 %v2188_v14, %v2187_v12 }
 0xb98   :  { %v2190_v19 = vmul.f32 0.0625, %v2189_v18 }
 0xb9a   :  { %v2191_v20 = vadd.f32 1e-05, %v2190_v19 }
 0xb9c   :  { %3082 = vrsqrt.f32 %v2191_v20 }
 0xba6   :  { %v3083_v21 = vpop.eup %3082 }
 0xba7   :  { %v2193_v51 = vmul.f32 %v3083_v21, %v2177_v5  ;;  %v2194_v60 = vmul.f32 %v3083_v21, %v2178_v6 }
 0xba9   :  { %v2203_v29 = vmul.f32 %v2336_v24, %v2193_v51  ;;  %v2204_v15 = vmul.f32 %v2336_v24, %v2194_v60 }
 0xbab   :  { %v2213_v30 = vadd.f32 %v2338_v48, %v2203_v29  ;;  %v2214_v31 = vadd.f32 %v2338_v48, %v2204_v15 }
 0xbad   :  { %2215 = vst.msk [vmem:[#allocation11] sm:$0xff] %vm444_vm7, %v2213_v30  ;;  %2216 = vst.msk [vmem:[#allocation11 + $0x8] sm:$0xff] %vm444_vm7, %v2214_v31 }
 0xbae   :  { %3205 = shalt.err (!%p3202_p2)
}
 0xbaf   :  { %s3206_s7 = scalar_lea.hbm %s3892_s15, 256 }
 0xbb0   :  { %p3207_p3 = scmp.ne.s32.totalorder %s3892_s15, %s3206_s7  ;;  %p3210_p4 = scmp.lt.u32.totalorder %s3206_s7, %s3892_s15 }
 0xbb2   :  { %p3212_p5 = pnand %p3210_p4, %p3207_p3 }
 0xbb4   :  { %3215 = shalt.err (!%p3212_p5)
}
 0xbb5   :  { %2228 = dma.vmem_to_hbm [thread:$0]  %s2223_s4, 256, %s3892_s15, [#allocation4], %s3227_s19, %s3227_s19, %s3228_s28  }
 0xbb6   :  { %3222 = dma.done.wait [#allocation4], 256  }
 0xbb7   :  { %3223 = vsyncadd [#allocation4], 4294967040 }
 0xbb8   :  { %2232 = vsyncpa [#allocation3], 1 }
 0xbb9   :  { %2233 = vsyncpa [#allocation6], 1 }
 0xbba   :  { %2234 = vsyncpa [#allocation9], 1 }
 0xbbb   :  { %2235 = vsyncpa [#allocation4], 1 }

</bundles_post_ra>
